<compile_context>
chip_gen: v7x
topology: tpu7x:2x2x1
jax: 0.10.0
libtpu: 0.0.40
codegen_flags: <defaults>
</compile_context>

<pallas_src>
import functools

import jax
import jax.numpy as jnp
from jax.experimental import pallas as pl
from jax.experimental.pallas import tpu as pltpu


# ---------------------------------------------------------------------------
# Fused residual-block kernel
# ---------------------------------------------------------------------------
def _resblock_kernel(*refs, stride, th, ow, g1, g2, rc, has_projection):
    """One grid step = (one image, one tile of `th` output rows).

    refs (projection case):
      xt_ref : (s*s*TH, PW, Cin) f32   per-tile phase-decomposed padded input
      w1_ref : (9//g1, g1*Cin, C0p)    bf16, BN1 scale folded in
      b1_ref : (1, C0p) f32
      w2_ref : (9//g2, g2*C0p, C1p)    bf16, BN2 scale folded in
      b2_ref : (1, C1p) f32
      wsc_ref: (Cin, C1p) bf16         1x1 shortcut weights (only if projection)
      bsc_ref: (1, C1p) f32            (only if projection)
      o_ref  : (th*ow, C1p) f32        output tile (channel padded, lane dense)
      ypad   : (th+2, ow+2, C0p) bf16  VMEM scratch: conv1 output + zero pads
    """
    if has_projection:
        (xt_ref, w1_ref, b1_ref, w2_ref, b2_ref,
         wsc_ref, bsc_ref, o_ref, ypad_ref) = refs
    else:
        xt_ref, w1_ref, b1_ref, w2_ref, b2_ref, o_ref, ypad_ref = refs
        wsc_ref = bsc_ref = None

    s = stride
    e = 2 // s                       # extra phase rows/cols needed per phase
    TH = th + e + 2                  # phase-image rows per tile (halo + zero pads)
    th_h = th + 2                    # conv1 rows incl. conv2's 1-row halo
    cin = xt_ref.shape[-1]
    c0p = ypad_ref.shape[-1]
    c1p = o_ref.shape[-1]
    r = pl.program_id(1)

    # ---- conv1 (3x3, stride s) + folded BN1 + ReLU, staged into ypad (bf16) ---
    for t0 in range(0, th_h, rc):
        rows = min(rc, th_h - t0)
        m = rows * ow
        acc = None
        for gi in range(9 // g1):
            pieces = []
            for tl in range(g1):
                t = gi * g1 + tl
                kh, kw = t // 3, t % 3
                ph = (kh % s) * s + (kw % s)
                dh, dw = kh // s, kw // s
                r0 = ph * TH + t0 + dh
                piece = xt_ref[r0:r0 + rows, dw:dw + ow, :]
                pieces.append(piece.reshape(m, cin).astype(jnp.bfloat16))
            patch = pieces[0] if g1 == 1 else jnp.concatenate(pieces, axis=-1)
            part = jnp.dot(patch, w1_ref[gi], preferred_element_type=jnp.float32)
            acc = part if acc is None else acc + part
        y = jnp.maximum(acc + b1_ref[...], 0.0).astype(jnp.bfloat16)
        # write each interior row exactly once, zero pad columns folded in
        zcol = jnp.zeros((rows, 1, c0p), jnp.bfloat16)
        ypad_ref[t0:t0 + rows, :, :] = jnp.concatenate(
            [zcol, y.reshape(rows, ow, c0p), zcol], axis=1)

    # conv1 rows that fall outside the image (top halo of the first row tile,
    # bottom halo of the last one) are conv2's zero padding.
    @pl.when(r == 0)
    def _():
        ypad_ref[0:1, :, :] = jnp.zeros((1, ow + 2, c0p), jnp.bfloat16)

    @pl.when(r == pl.num_programs(1) - 1)
    def _():
        ypad_ref[th + 1:th + 2, :, :] = jnp.zeros((1, ow + 2, c0p), jnp.bfloat16)

    # shortcut tap position: the center of a 3x3 at stride s == the 1x1 stride-s
    # conv (projection) == the input pixel itself (identity, s == 1).
    ph_sc = (1 % s) * s + (1 % s)
    d_sc = 1 // s

    # ---- conv2 (3x3, stride 1) + folded BN2 + shortcut + store ----------------
    for u0 in range(0, th, rc):
        rows = min(rc, th - u0)
        m = rows * ow
        acc = None
        for gi in range(9 // g2):
            pieces = []
            for tl in range(g2):
                t = gi * g2 + tl
                kh, kw = t // 3, t % 3
                piece = ypad_ref[u0 + kh:u0 + kh + rows, kw:kw + ow, :]
                pieces.append(piece.reshape(m, c0p))          # already bf16
            patch = pieces[0] if g2 == 1 else jnp.concatenate(pieces, axis=-1)
            part = jnp.dot(patch, w2_ref[gi], preferred_element_type=jnp.float32)
            acc = part if acc is None else acc + part
        out = acc + b2_ref[...]

        r0 = ph_sc * TH + u0 + d_sc + 1
        sc = xt_ref[r0:r0 + rows, d_sc:d_sc + ow, :].reshape(m, cin)
        if has_projection:
            out = out + jnp.dot(sc.astype(jnp.bfloat16), wsc_ref[...],
                                preferred_element_type=jnp.float32)
            out = out + bsc_ref[...]
        else:
            # identity shortcut: exact f32 residual add (cin == c1 here)
            if c1p > cin:
                sc = jnp.concatenate(
                    [sc, jnp.zeros((m, c1p - cin), jnp.float32)], axis=-1)
            out = out + sc

        # NOTE: no ReLU after the residual add, matching the PyTorch module.
        o_ref[u0 * ow:(u0 + rows) * ow, :] = out.astype(o_ref.dtype)


# ---------------------------------------------------------------------------
# Plain-JAX glue: tiling choices, phase decomposition, BN folding, weight prep
# ---------------------------------------------------------------------------
def _round_up(x, m):
    return (x + m - 1) // m * m


def _pick_tap_group(k_per_tap, max_k=512):
    """How many conv taps to concatenate into one MXU dot (K = g * k_per_tap)."""
    for g in (9, 3, 1):
        if g * k_per_tap <= max_k:
            return g
    return 1


def _pick_row_tile(oh, ow, target_m=256):
    """Largest divisor of OH giving <= target_m output positions per row tile,
    preferring >= 2 row tiles (megacore at small batch) and (8,128)-legal tiles."""
    divs = [d for d in range(1, oh + 1) if oh % d == 0]
    ok = [d for d in divs if d * ow <= target_m and (d == oh or (d * ow) % 8 == 0)]
    pref = [d for d in ok if d < oh]
    if pref:
        return max(pref)
    if ok:
        return max(ok)
    return oh


def _vmem_limit_bytes():
    """Generation-aware VMEM budget: ~3/4 of physical, capped (v5e/v6e ~96MiB,
    v7x ~48MiB); conservative fallback if the query is unavailable."""
    try:
        cap = int(pltpu.get_tpu_info().vmem_capacity_bytes)
    except Exception:
        cap = 64 * 1024 * 1024
    return max(32 * 1024 * 1024, min(cap * 3 // 4, 96 * 1024 * 1024))


def _prepare_input(x_nhwc, stride, oh, ow, th, nrt):
    """Pad by 1, split into stride*stride phase images, and pre-cut them into
    per-row-tile blocks with the conv2 row halo folded in, so the kernel's
    BlockSpec streams exactly one tile per grid step."""
    s = stride
    n, h, w, c = x_nhwc.shape
    e = 2 // s
    ph_rows, ph_cols = oh + e, ow + e
    xp = jnp.pad(x_nhwc, ((0, 0), (1, 1), (1, 1), (0, 0)))
    phases = []
    for a in range(s):
        for b in range(s):
            p = xp[:, a::s, b::s, :]
            p = p[:, :ph_rows, :ph_cols, :]
            p = jnp.pad(p, ((0, 0),
                            (1, ph_rows + 1 - p.shape[1]),   # +1 zero row top/bot
                            (0, ph_cols - p.shape[2]),
                            (0, 0)))
            phases.append(p)
    ximg = jnp.stack(phases, axis=1)          # (n, s*s, oh+e+2, ow+e, c)
    TH = th + e + 2
    tiles = [ximg[:, :, r * th:r * th + TH] for r in range(nrt)]
    xt = jnp.stack(tiles, axis=1)             # (n, nrt, s*s, TH, PW, c)
    return xt.reshape(n * nrt, s * s * TH, ph_cols, c)


def fold_bn(gamma, beta, mean, var, eps=1e-5):
    scale = gamma / jnp.sqrt(var + eps)
    return scale, beta - mean * scale


def _prep_weights(params, cin, c0, c1, c0p, c1p, g1, g2, has_projection):
    s1, b1 = fold_bn(*params["bn1"])
    s2, b2 = fold_bn(*params["bn2"])
    w1 = params["w1"].reshape(9, cin, c0) * s1[None, None, :]
    w1 = jnp.pad(w1, ((0, 0), (0, 0), (0, c0p - c0)))
    w1 = w1.reshape(9 // g1, g1 * cin, c0p).astype(jnp.bfloat16)
    w2 = params["w2"].reshape(9, c0, c1) * s2[None, None, :]
    w2 = jnp.pad(w2, ((0, 0), (0, c0p - c0), (0, c1p - c1)))
    w2 = w2.reshape(9 // g2, g2 * c0p, c1p).astype(jnp.bfloat16)
    b1 = jnp.pad(b1, (0, c0p - c0)).reshape(1, c0p).astype(jnp.float32)
    b2 = jnp.pad(b2, (0, c1p - c1)).reshape(1, c1p).astype(jnp.float32)
    if not has_projection:
        return w1, b1, w2, b2
    ssc, bsc = fold_bn(*params["bn_sc"])
    wsc = params["w_sc"] * ssc[None, :]
    wsc = jnp.pad(wsc, ((0, 0), (0, c1p - c1))).astype(jnp.bfloat16)
    bsc = jnp.pad(bsc, (0, c1p - c1)).reshape(1, c1p).astype(jnp.float32)
    return w1, b1, w2, b2, wsc, bsc


def init_params(key, inchannels, channels_list, stride):
    c_last = channels_list[-1]
    ks = jax.random.split(key, 6)

    def conv_w(k, kh, kw, cin, cout):
        fan_in = cin * kh * kw
        return jax.random.normal(k, (kh, kw, cin, cout), jnp.float32) / jnp.sqrt(fan_in)

    def bn_p(k, c):
        k1, k2, k3, k4 = jax.random.split(k, 4)
        gamma = 1.0 + 0.1 * jax.random.normal(k1, (c,), jnp.float32)
        beta = 0.1 * jax.random.normal(k2, (c,), jnp.float32)
        mean = 0.1 * jax.random.normal(k3, (c,), jnp.float32)
        var = 0.5 + jnp.abs(jax.random.normal(k4, (c,), jnp.float32))
        return (gamma, beta, mean, var)

    params = {
        "w1": conv_w(ks[0], 3, 3, inchannels, channels_list[0]),
        "bn1": bn_p(ks[1], channels_list[0]),
        "w2": conv_w(ks[2], 3, 3, channels_list[0], channels_list[1]),
        "bn2": bn_p(ks[3], channels_list[1]),
    }
    if inchannels != c_last or stride != 1:
        params["w_sc"] = conv_w(ks[4], 1, 1, inchannels, c_last)[0, 0]  # (Cin, Cout)
        params["bn_sc"] = bn_p(ks[5], c_last)
    return params


# ---------------------------------------------------------------------------
# Residual block forward (single fused pallas_call)
# ---------------------------------------------------------------------------
@functools.partial(jax.jit, static_argnums=(2,))
def residual_block_forward(x_nchw, params, stride):
    s = int(stride)
    x = jnp.transpose(x_nchw, (0, 2, 3, 1)).astype(jnp.float32)   # NCHW -> NHWC
    n, h, w, cin = x.shape
    c0 = params["w1"].shape[-1]
    c1 = params["w2"].shape[-1]
    c0p, c1p = _round_up(c0, 128), _round_up(c1, 128)
    oh, ow = (h - 1) // s + 1, (w - 1) // s + 1
    e = 2 // s

    th = _pick_row_tile(oh, ow, target_m=256)
    nrt = oh // th
    tm = th * ow
    TH = th + e + 2
    PW = ow + e
    rc = max(1, 128 // ow)                    # conv rows per in-kernel chunk

    has_projection = "w_sc" in params
    g1 = _pick_tap_group(cin)
    g2 = _pick_tap_group(c0p)

    xt = _prepare_input(x, s, oh, ow, th, nrt)          # (n*nrt, s*s*TH, PW, cin)
    weights = _prep_weights(params, cin, c0, c1, c0p, c1p, g1, g2, has_projection)

    kern = functools.partial(
        _resblock_kernel, stride=s, th=th, ow=ow, g1=g1, g2=g2, rc=rc,
        has_projection=has_projection)

    in_specs = [
        pl.BlockSpec((None, s * s * TH, PW, cin),
                     lambda b, r: (b * nrt + r, 0, 0, 0)),
        pl.BlockSpec((9 // g1, g1 * cin, c0p), lambda b, r: (0, 0, 0)),
        pl.BlockSpec((1, c0p), lambda b, r: (0, 0)),
        pl.BlockSpec((9 // g2, g2 * c0p, c1p), lambda b, r: (0, 0, 0)),
        pl.BlockSpec((1, c1p), lambda b, r: (0, 0)),
    ]
    if has_projection:
        in_specs += [
            pl.BlockSpec((cin, c1p), lambda b, r: (0, 0)),
            pl.BlockSpec((1, c1p), lambda b, r: (0, 0)),
        ]

    out = pl.pallas_call(
        kern,
        out_shape=jax.ShapeDtypeStruct((n, oh * ow, c1p), jnp.float32),
        grid=(n, nrt),
        in_specs=in_specs,
        out_specs=pl.BlockSpec((None, tm, c1p), lambda b, r: (b, r, 0)),
        scratch_shapes=[pltpu.VMEM((th + 2, ow + 2, c0p), jnp.bfloat16)],
        compiler_params=pltpu.CompilerParams(
            dimension_semantics=("parallel", "parallel"),
            vmem_limit_bytes=_vmem_limit_bytes()),
    )(xt, *weights)

    out = out[:, :, :c1].reshape(n, oh, ow, c1)
    return jnp.transpose(out, (0, 3, 1, 2))                       # NHWC -> NCHW


# ---------------------------------------------------------------------------
# Pure-JAX reference (for verification)
# ---------------------------------------------------------------------------
def reference_forward(x, params, stride):
    eps = 1e-5

    def conv(x, w_hwio, s, pad):
        w_oihw = jnp.transpose(w_hwio, (3, 2, 0, 1))
        return jax.lax.conv_general_dilated(
            x, w_oihw, (s, s), [(pad, pad), (pad, pad)],
            dimension_numbers=("NCHW", "OIHW", "NCHW"),
            precision=jax.lax.Precision.HIGHEST)

    def bn(x, g, b, m, v):
        g, b, m, v = [t[None, :, None, None] for t in (g, b, m, v)]
        return (x - m) / jnp.sqrt(v + eps) * g + b

    out = conv(x, params["w1"], stride, 1)
    out = jax.nn.relu(bn(out, *params["bn1"]))
    out = conv(out, params["w2"], 1, 1)
    out = bn(out, *params["bn2"])
    if "w_sc" in params:
        identity = bn(conv(x, params["w_sc"][None, None], stride, 0),
                      *params["bn_sc"])
    else:
        identity = x
    return out + identity


def _check(out, ref, rtol=2e-2, atol=5e-2):
    # relative + absolute tolerance sized for the bf16 MXU path
    return bool(jnp.all(jnp.abs(out - ref) <= atol + rtol * jnp.abs(ref)))


# ---------------------------------------------------------------------------
if __name__ == "__main__":
    key = jax.random.PRNGKey(0)
    kx1, kp1, kx2, kp2 = jax.random.split(key, 4)

    # Config A: ResidualBlock(inchannels=4, channels_list=[8, 8], stride=2)
    #           (downsampling block with a conv+BN projection shortcut)
    x1 = jax.random.normal(kx1, (2, 4, 16, 16), jnp.float32)
    p1 = init_params(kp1, 4, [8, 8], 2)
    out1 = jax.block_until_ready(residual_block_forward(x1, p1, 2))
    ref1 = reference_forward(x1, p1, 2)
    assert out1.shape == ref1.shape, (out1.shape, ref1.shape)
    ok1 = _check(out1, ref1)

    # Config B: ResidualBlock(inchannels=8, channels_list=[8, 8], stride=1)
    #           (identity shortcut, exact f32 residual add)
    x2 = jax.random.normal(kx2, (2, 8, 16, 16), jnp.float32)
    p2 = init_params(kp2, 8, [8, 8], 1)
    out2 = jax.block_until_ready(residual_block_forward(x2, p2, 1))
    ref2 = reference_forward(x2, p2, 1)
    assert out2.shape == ref2.shape, (out2.shape, ref2.shape)
    ok2 = _check(out2, ref2)

    if not (ok1 and ok2):
        e1 = float(jnp.max(jnp.abs(out1 - ref1)))
        e2 = float(jnp.max(jnp.abs(out2 - ref2)))
        raise AssertionError(f"Pallas/reference mismatch: err1={e1}, err2={e2}")
    print("KERNEL_OK")
</pallas_src>

<mosaic_0001>
module attributes {stable_mosaic.version = 11 : i64} {
  func.func @_resblock_kernel(%arg0: i32, %arg1: i32, %arg2: memref<1x28x9x4xf32, #tpu.memory_space<vmem>>, %arg3: memref<1x36x128xbf16, #tpu.memory_space<vmem>>, %arg4: memref<1x128xf32, #tpu.memory_space<vmem>>, %arg5: memref<3x384x128xbf16, #tpu.memory_space<vmem>>, %arg6: memref<1x128xf32, #tpu.memory_space<vmem>>, %arg7: memref<4x128xbf16, #tpu.memory_space<vmem>>, %arg8: memref<1x128xf32, #tpu.memory_space<vmem>>, %arg9: memref<1x32x128xf32, #tpu.memory_space<vmem>>, %arg10: memref<6x10x128xbf16, #tpu.memory_space<vmem>>) attributes {dimension_semantics = [#tpu.dimension_semantics<parallel>, #tpu.dimension_semantics<parallel>], iteration_bounds = array<i64: 2, 2>, scalar_prefetch = 0 : i64, scratch_operands = 1 : i64, tpu.core_type = #tpu.core_type<tc>, window_params = [{transform_indices = @transform_0, window_bounds = array<i64: 1, 28, 9, 4>}, {pipeline_mode = #tpu.pipeline_mode<synchronous>, transform_indices = @transform_1, window_bounds = array<i64: 1, 36, 128>}, {pipeline_mode = #tpu.pipeline_mode<synchronous>, transform_indices = @transform_2, window_bounds = array<i64: 1, 128>}, {pipeline_mode = #tpu.pipeline_mode<synchronous>, transform_indices = @transform_3, window_bounds = array<i64: 3, 384, 128>}, {pipeline_mode = #tpu.pipeline_mode<synchronous>, transform_indices = @transform_4, window_bounds = array<i64: 1, 128>}, {pipeline_mode = #tpu.pipeline_mode<synchronous>, transform_indices = @transform_5, window_bounds = array<i64: 4, 128>}, {pipeline_mode = #tpu.pipeline_mode<synchronous>, transform_indices = @transform_6, window_bounds = array<i64: 1, 128>}, {transform_indices = @transform_7, window_bounds = array<i64: 1, 32, 128>}]} {
    %c0 = arith.constant 0 : index
    %c0_0 = arith.constant 0 : index
    %c0_1 = arith.constant 0 : index
    %c0_2 = arith.constant 0 : index
    %0 = vector.load %arg2[%c0, %c0_0, %c0_1, %c0_2] : memref<1x28x9x4xf32, #tpu.memory_space<vmem>>, vector<1x6x8x4xf32>
    %1 = vector.shape_cast %0 : vector<1x6x8x4xf32> to vector<6x8x4xf32>
    %2 = vector.shape_cast %1 : vector<6x8x4xf32> to vector<48x4xf32>
    %3 = arith.truncf %2 : vector<48x4xf32> to vector<48x4xbf16>
    %c0_3 = arith.constant 0 : index
    %c7 = arith.constant 7 : index
    %c0_4 = arith.constant 0 : index
    %c0_5 = arith.constant 0 : index
    %4 = vector.load %arg2[%c0_3, %c7, %c0_4, %c0_5] : memref<1x28x9x4xf32, #tpu.memory_space<vmem>>, vector<1x6x8x4xf32>
    %5 = vector.shape_cast %4 : vector<1x6x8x4xf32> to vector<6x8x4xf32>
    %6 = vector.shape_cast %5 : vector<6x8x4xf32> to vector<48x4xf32>
    %7 = arith.truncf %6 : vector<48x4xf32> to vector<48x4xbf16>
    %c0_6 = arith.constant 0 : index
    %c0_7 = arith.constant 0 : index
    %c1 = arith.constant 1 : index
    %c0_8 = arith.constant 0 : index
    %8 = vector.load %arg2[%c0_6, %c0_7, %c1, %c0_8] : memref<1x28x9x4xf32, #tpu.memory_space<vmem>>, vector<1x6x8x4xf32>
    %9 = vector.shape_cast %8 : vector<1x6x8x4xf32> to vector<6x8x4xf32>
    %10 = vector.shape_cast %9 : vector<6x8x4xf32> to vector<48x4xf32>
    %11 = arith.truncf %10 : vector<48x4xf32> to vector<48x4xbf16>
    %c0_9 = arith.constant 0 : index
    %c14 = arith.constant 14 : index
    %c0_10 = arith.constant 0 : index
    %c0_11 = arith.constant 0 : index
    %12 = vector.load %arg2[%c0_9, %c14, %c0_10, %c0_11] : memref<1x28x9x4xf32, #tpu.memory_space<vmem>>, vector<1x6x8x4xf32>
    %13 = vector.shape_cast %12 : vector<1x6x8x4xf32> to vector<6x8x4xf32>
    %14 = vector.shape_cast %13 : vector<6x8x4xf32> to vector<48x4xf32>
    %15 = arith.truncf %14 : vector<48x4xf32> to vector<48x4xbf16>
    %c0_12 = arith.constant 0 : index
    %c21 = arith.constant 21 : index
    %c0_13 = arith.constant 0 : index
    %c0_14 = arith.constant 0 : index
    %16 = vector.load %arg2[%c0_12, %c21, %c0_13, %c0_14] : memref<1x28x9x4xf32, #tpu.memory_space<vmem>>, vector<1x6x8x4xf32>
    %17 = vector.shape_cast %16 : vector<1x6x8x4xf32> to vector<6x8x4xf32>
    %18 = vector.shape_cast %17 : vector<6x8x4xf32> to vector<48x4xf32>
    %19 = arith.truncf %18 : vector<48x4xf32> to vector<48x4xbf16>
    %c0_15 = arith.constant 0 : index
    %c14_16 = arith.constant 14 : index
    %c1_17 = arith.constant 1 : index
    %c0_18 = arith.constant 0 : index
    %20 = vector.load %arg2[%c0_15, %c14_16, %c1_17, %c0_18] : memref<1x28x9x4xf32, #tpu.memory_space<vmem>>, vector<1x6x8x4xf32>
    %21 = vector.shape_cast %20 : vector<1x6x8x4xf32> to vector<6x8x4xf32>
    %22 = vector.shape_cast %21 : vector<6x8x4xf32> to vector<48x4xf32>
    %23 = arith.truncf %22 : vector<48x4xf32> to vector<48x4xbf16>
    %c0_19 = arith.constant 0 : index
    %c1_20 = arith.constant 1 : index
    %c0_21 = arith.constant 0 : index
    %c0_22 = arith.constant 0 : index
    %24 = vector.load %arg2[%c0_19, %c1_20, %c0_21, %c0_22] : memref<1x28x9x4xf32, #tpu.memory_space<vmem>>, vector<1x6x8x4xf32>
    %25 = vector.shape_cast %24 : vector<1x6x8x4xf32> to vector<6x8x4xf32>
    %26 = vector.shape_cast %25 : vector<6x8x4xf32> to vector<48x4xf32>
    %27 = arith.truncf %26 : vector<48x4xf32> to vector<48x4xbf16>
    %c0_23 = arith.constant 0 : index
    %c8 = arith.constant 8 : index
    %c0_24 = arith.constant 0 : index
    %c0_25 = arith.constant 0 : index
    %28 = vector.load %arg2[%c0_23, %c8, %c0_24, %c0_25] : memref<1x28x9x4xf32, #tpu.memory_space<vmem>>, vector<1x6x8x4xf32>
    %29 = vector.shape_cast %28 : vector<1x6x8x4xf32> to vector<6x8x4xf32>
    %30 = vector.shape_cast %29 : vector<6x8x4xf32> to vector<48x4xf32>
    %31 = arith.truncf %30 : vector<48x4xf32> to vector<48x4xbf16>
    %c0_26 = arith.constant 0 : index
    %c1_27 = arith.constant 1 : index
    %c1_28 = arith.constant 1 : index
    %c0_29 = arith.constant 0 : index
    %32 = vector.load %arg2[%c0_26, %c1_27, %c1_28, %c0_29] : memref<1x28x9x4xf32, #tpu.memory_space<vmem>>, vector<1x6x8x4xf32>
    %33 = vector.shape_cast %32 : vector<1x6x8x4xf32> to vector<6x8x4xf32>
    %34 = vector.shape_cast %33 : vector<6x8x4xf32> to vector<48x4xf32>
    %35 = arith.truncf %34 : vector<48x4xf32> to vector<48x4xbf16>
    %36 = tpu.concatenate %3, %7, %11, %15, %19, %23, %27, %31, %35 in 1 : vector<48x4xbf16>, vector<48x4xbf16>, vector<48x4xbf16>, vector<48x4xbf16>, vector<48x4xbf16>, vector<48x4xbf16>, vector<48x4xbf16>, vector<48x4xbf16>, vector<48x4xbf16> -> vector<48x36xbf16>
    %c0_30 = arith.constant 0 : index
    %c0_31 = arith.constant 0 : index
    %c0_32 = arith.constant 0 : index
    %37 = vector.load %arg3[%c0_30, %c0_31, %c0_32] : memref<1x36x128xbf16, #tpu.memory_space<vmem>>, vector<1x36x128xbf16>
    %38 = vector.shape_cast %37 : vector<1x36x128xbf16> to vector<36x128xbf16>
    %cst = arith.constant dense<0.000000e+00> : vector<48x128xf32>
    %39 = tpu.matmul %36, %38, %cst {dimension_numbers = #tpu.dot_dimension_numbers<[1], [0], [0], [1], [0, 0, 1, 1], [], []>} : vector<48x36xbf16>, vector<36x128xbf16>, vector<48x128xf32> -> vector<48x128xf32>
    %c0_33 = arith.constant 0 : index
    %c0_34 = arith.constant 0 : index
    %40 = vector.load %arg4[%c0_33, %c0_34] : memref<1x128xf32, #tpu.memory_space<vmem>>, vector<1x128xf32>
    %41 = vector.broadcast %40 : vector<1x128xf32> to vector<48x128xf32>
    %42 = arith.addf %39, %41 : vector<48x128xf32>
    %cst_35 = arith.constant 0.000000e+00 : f32
    %43 = vector.broadcast %cst_35 : f32 to vector<48x128xf32>
    %44 = arith.maximumf %42, %43 : vector<48x128xf32>
    %45 = arith.truncf %44 : vector<48x128xf32> to vector<48x128xbf16>
    %cst_36 = arith.constant 0.000000e+00 : bf16
    %46 = vector.broadcast %cst_36 : bf16 to vector<6x1x128xbf16>
    %47 = vector.shape_cast %45 : vector<48x128xbf16> to vector<6x8x128xbf16>
    %48 = tpu.concatenate %46, %47, %46 in 1 : vector<6x1x128xbf16>, vector<6x8x128xbf16>, vector<6x1x128xbf16> -> vector<6x10x128xbf16>
    %c0_37 = arith.constant 0 : index
    %c0_38 = arith.constant 0 : index
    %c0_39 = arith.constant 0 : index
    %49 = vector.load %arg10[%c0_37, %c0_38, %c0_39] : memref<6x10x128xbf16, #tpu.memory_space<vmem>>, vector<6x10x128xbf16>
    tpu.vector_store %arg10[%c0_37, %c0_38, %c0_39], %48 {strides = array<i32>} : memref<6x10x128xbf16, #tpu.memory_space<vmem>>, vector<6x10x128xbf16>,
    %c0_i32 = arith.constant 0 : i32
    %50 = arith.cmpi eq, %arg1, %c0_i32 : i32
    %51 = arith.extui %50 : i1 to i32
    %c0_i32_40 = arith.constant 0 : i32
    %52 = arith.cmpi ne, %51, %c0_i32_40 : i32
    scf.if %52 {
      %cst_93 = arith.constant 0.000000e+00 : bf16
      %104 = vector.broadcast %cst_93 : bf16 to vector<1x10x128xbf16>
      %c0_94 = arith.constant 0 : index
      %c0_95 = arith.constant 0 : index
      %c0_96 = arith.constant 0 : index
      %105 = vector.load %arg10[%c0_94, %c0_95, %c0_96] : memref<6x10x128xbf16, #tpu.memory_space<vmem>>, vector<1x10x128xbf16>
      tpu.vector_store %arg10[%c0_94, %c0_95, %c0_96], %104 {strides = array<i32>} : memref<6x10x128xbf16, #tpu.memory_space<vmem>>, vector<1x10x128xbf16>,
    } else {
    }
    %c1_i32 = arith.constant 1 : i32
    %53 = arith.cmpi eq, %arg1, %c1_i32 : i32
    %54 = arith.extui %53 : i1 to i32
    %c0_i32_41 = arith.constant 0 : i32
    %55 = arith.cmpi ne, %54, %c0_i32_41 : i32
    scf.if %55 {
      %cst_93 = arith.constant 0.000000e+00 : bf16
      %104 = vector.broadcast %cst_93 : bf16 to vector<1x10x128xbf16>
      %c5 = arith.constant 5 : index
      %c0_94 = arith.constant 0 : index
      %c0_95 = arith.constant 0 : index
      %105 = vector.load %arg10[%c5, %c0_94, %c0_95] : memref<6x10x128xbf16, #tpu.memory_space<vmem>>, vector<1x10x128xbf16>
      tpu.vector_store %arg10[%c5, %c0_94, %c0_95], %104 {strides = array<i32>} : memref<6x10x128xbf16, #tpu.memory_space<vmem>>, vector<1x10x128xbf16>,
    } else {
    }
    %c0_42 = arith.constant 0 : index
    %c0_43 = arith.constant 0 : index
    %c0_44 = arith.constant 0 : index
    %56 = vector.load %arg10[%c0_42, %c0_43, %c0_44] : memref<6x10x128xbf16, #tpu.memory_space<vmem>>, vector<4x8x128xbf16>
    %57 = vector.shape_cast %56 : vector<4x8x128xbf16> to vector<32x128xbf16>
    %c0_45 = arith.constant 0 : index
    %c1_46 = arith.constant 1 : index
    %c0_47 = arith.constant 0 : index
    %58 = vector.load %arg10[%c0_45, %c1_46, %c0_47] : memref<6x10x128xbf16, #tpu.memory_space<vmem>>, vector<4x8x128xbf16>
    %59 = vector.shape_cast %58 : vector<4x8x128xbf16> to vector<32x128xbf16>
    %c0_48 = arith.constant 0 : index
    %c2 = arith.constant 2 : index
    %c0_49 = arith.constant 0 : index
    %60 = vector.load %arg10[%c0_48, %c2, %c0_49] : memref<6x10x128xbf16, #tpu.memory_space<vmem>>, vector<4x8x128xbf16>
    %61 = vector.shape_cast %60 : vector<4x8x128xbf16> to vector<32x128xbf16>
    %62 = tpu.concatenate %57, %59, %61 in 1 : vector<32x128xbf16>, vector<32x128xbf16>, vector<32x128xbf16> -> vector<32x384xbf16>
    %c0_50 = arith.constant 0 : index
    %c0_51 = arith.constant 0 : index
    %c0_52 = arith.constant 0 : index
    %63 = vector.load %arg5[%c0_50, %c0_51, %c0_52] : memref<3x384x128xbf16, #tpu.memory_space<vmem>>, vector<1x384x128xbf16>
    %64 = vector.shape_cast %63 : vector<1x384x128xbf16> to vector<384x128xbf16>
    %cst_53 = arith.constant dense<0.000000e+00> : vector<32x128xf32>
    %65 = tpu.matmul %62, %64, %cst_53 {dimension_numbers = #tpu.dot_dimension_numbers<[1], [0], [0], [1], [0, 0, 1, 1], [], []>} : vector<32x384xbf16>, vector<384x128xbf16>, vector<32x128xf32> -> vector<32x128xf32>
    %c1_54 = arith.constant 1 : index
    %c0_55 = arith.constant 0 : index
    %c0_56 = arith.constant 0 : index
    %66 = vector.load %arg10[%c1_54, %c0_55, %c0_56] : memref<6x10x128xbf16, #tpu.memory_space<vmem>>, vector<4x8x128xbf16>
    %67 = vector.shape_cast %66 : vector<4x8x128xbf16> to vector<32x128xbf16>
    %c1_57 = arith.constant 1 : index
    %c1_58 = arith.constant 1 : index
    %c0_59 = arith.constant 0 : index
    %68 = vector.load %arg10[%c1_57, %c1_58, %c0_59] : memref<6x10x128xbf16, #tpu.memory_space<vmem>>, vector<4x8x128xbf16>
    %69 = vector.shape_cast %68 : vector<4x8x128xbf16> to vector<32x128xbf16>
    %c1_60 = arith.constant 1 : index
    %c2_61 = arith.constant 2 : index
    %c0_62 = arith.constant 0 : index
    %70 = vector.load %arg10[%c1_60, %c2_61, %c0_62] : memref<6x10x128xbf16, #tpu.memory_space<vmem>>, vector<4x8x128xbf16>
    %71 = vector.shape_cast %70 : vector<4x8x128xbf16> to vector<32x128xbf16>
    %72 = tpu.concatenate %67, %69, %71 in 1 : vector<32x128xbf16>, vector<32x128xbf16>, vector<32x128xbf16> -> vector<32x384xbf16>
    %c1_63 = arith.constant 1 : index
    %c0_64 = arith.constant 0 : index
    %c0_65 = arith.constant 0 : index
    %73 = vector.load %arg5[%c1_63, %c0_64, %c0_65] : memref<3x384x128xbf16, #tpu.memory_space<vmem>>, vector<1x384x128xbf16>
    %74 = vector.shape_cast %73 : vector<1x384x128xbf16> to vector<384x128xbf16>
    %cst_66 = arith.constant dense<0.000000e+00> : vector<32x128xf32>
    %75 = tpu.matmul %72, %74, %cst_66 {dimension_numbers = #tpu.dot_dimension_numbers<[1], [0], [0], [1], [0, 0, 1, 1], [], []>} : vector<32x384xbf16>, vector<384x128xbf16>, vector<32x128xf32> -> vector<32x128xf32>
    %76 = arith.addf %65, %75 : vector<32x128xf32>
    %c2_67 = arith.constant 2 : index
    %c0_68 = arith.constant 0 : index
    %c0_69 = arith.constant 0 : index
    %77 = vector.load %arg10[%c2_67, %c0_68, %c0_69] : memref<6x10x128xbf16, #tpu.memory_space<vmem>>, vector<4x8x128xbf16>
    %78 = vector.shape_cast %77 : vector<4x8x128xbf16> to vector<32x128xbf16>
    %c2_70 = arith.constant 2 : index
    %c1_71 = arith.constant 1 : index
    %c0_72 = arith.constant 0 : index
    %79 = vector.load %arg10[%c2_70, %c1_71, %c0_72] : memref<6x10x128xbf16, #tpu.memory_space<vmem>>, vector<4x8x128xbf16>
    %80 = vector.shape_cast %79 : vector<4x8x128xbf16> to vector<32x128xbf16>
    %c2_73 = arith.constant 2 : index
    %c2_74 = arith.constant 2 : index
    %c0_75 = arith.constant 0 : index
    %81 = vector.load %arg10[%c2_73, %c2_74, %c0_75] : memref<6x10x128xbf16, #tpu.memory_space<vmem>>, vector<4x8x128xbf16>
    %82 = vector.shape_cast %81 : vector<4x8x128xbf16> to vector<32x128xbf16>
    %83 = tpu.concatenate %78, %80, %82 in 1 : vector<32x128xbf16>, vector<32x128xbf16>, vector<32x128xbf16> -> vector<32x384xbf16>
    %c2_76 = arith.constant 2 : index
    %c0_77 = arith.constant 0 : index
    %c0_78 = arith.constant 0 : index
    %84 = vector.load %arg5[%c2_76, %c0_77, %c0_78] : memref<3x384x128xbf16, #tpu.memory_space<vmem>>, vector<1x384x128xbf16>
    %85 = vector.shape_cast %84 : vector<1x384x128xbf16> to vector<384x128xbf16>
    %cst_79 = arith.constant dense<0.000000e+00> : vector<32x128xf32>
    %86 = tpu.matmul %83, %85, %cst_79 {dimension_numbers = #tpu.dot_dimension_numbers<[1], [0], [0], [1], [0, 0, 1, 1], [], []>} : vector<32x384xbf16>, vector<384x128xbf16>, vector<32x128xf32> -> vector<32x128xf32>
    %87 = arith.addf %76, %86 : vector<32x128xf32>
    %c0_80 = arith.constant 0 : index
    %c0_81 = arith.constant 0 : index
    %88 = vector.load %arg6[%c0_80, %c0_81] : memref<1x128xf32, #tpu.memory_space<vmem>>, vector<1x128xf32>
    %89 = vector.broadcast %88 : vector<1x128xf32> to vector<32x128xf32>
    %90 = arith.addf %87, %89 : vector<32x128xf32>
    %c0_82 = arith.constant 0 : index
    %c22 = arith.constant 22 : index
    %c0_83 = arith.constant 0 : index
    %c0_84 = arith.constant 0 : index
    %91 = vector.load %arg2[%c0_82, %c22, %c0_83, %c0_84] : memref<1x28x9x4xf32, #tpu.memory_space<vmem>>, vector<1x4x8x4xf32>
    %92 = vector.shape_cast %91 : vector<1x4x8x4xf32> to vector<4x8x4xf32>
    %93 = vector.shape_cast %92 : vector<4x8x4xf32> to vector<32x4xf32>
    %94 = arith.truncf %93 : vector<32x4xf32> to vector<32x4xbf16>
    %c0_85 = arith.constant 0 : index
    %c0_86 = arith.constant 0 : index
    %95 = vector.load %arg7[%c0_85, %c0_86] : memref<4x128xbf16, #tpu.memory_space<vmem>>, vector<4x128xbf16>
    %cst_87 = arith.constant dense<0.000000e+00> : vector<32x128xf32>
    %96 = tpu.matmul %94, %95, %cst_87 {dimension_numbers = #tpu.dot_dimension_numbers<[1], [0], [0], [1], [0, 0, 1, 1], [], []>} : vector<32x4xbf16>, vector<4x128xbf16>, vector<32x128xf32> -> vector<32x128xf32>
    %97 = arith.addf %90, %96 : vector<32x128xf32>
    %c0_88 = arith.constant 0 : index
    %c0_89 = arith.constant 0 : index
    %98 = vector.load %arg8[%c0_88, %c0_89] : memref<1x128xf32, #tpu.memory_space<vmem>>, vector<1x128xf32>
    %99 = vector.broadcast %98 : vector<1x128xf32> to vector<32x128xf32>
    %100 = arith.addf %97, %99 : vector<32x128xf32>
    %c0_90 = arith.constant 0 : index
    %c0_91 = arith.constant 0 : index
    %c0_92 = arith.constant 0 : index
    %101 = vector.load %arg9[%c0_90, %c0_91, %c0_92] : memref<1x32x128xf32, #tpu.memory_space<vmem>>, vector<1x32x128xf32>
    %102 = vector.shape_cast %101 : vector<1x32x128xf32> to vector<32x128xf32>
    %103 = vector.shape_cast %100 : vector<32x128xf32> to vector<1x32x128xf32>
    tpu.vector_store %arg9[%c0_90, %c0_91, %c0_92], %103 {strides = array<i32>} : memref<1x32x128xf32, #tpu.memory_space<vmem>>, vector<1x32x128xf32>,
    return
  }
  func.func @transform_0(%arg0: i32, %arg1: i32) -> (i32, i32, i32, i32) {
    %c2_i32 = arith.constant 2 : i32
    %0 = arith.muli %arg0, %c2_i32 : i32
    %1 = arith.addi %0, %arg1 : i32
    %c0_i32 = arith.constant 0 : i32
    %c0_i32_0 = arith.constant 0 : i32
    %c0_i32_1 = arith.constant 0 : i32
    %c0_i32_2 = arith.constant 0 : i32
    return %1, %c0_i32, %c0_i32_0, %c0_i32_1 : i32, i32, i32, i32
  }
  func.func @transform_1(%arg0: i32, %arg1: i32) -> (i32, i32, i32) {
    %c0_i32 = arith.constant 0 : i32
    %c0_i32_0 = arith.constant 0 : i32
    %c0_i32_1 = arith.constant 0 : i32
    %c0_i32_2 = arith.constant 0 : i32
    return %c0_i32, %c0_i32_0, %c0_i32_1 : i32, i32, i32
  }
  func.func @transform_2(%arg0: i32, %arg1: i32) -> (i32, i32) {
    %c0_i32 = arith.constant 0 : i32
    %c0_i32_0 = arith.constant 0 : i32
    %c0_i32_1 = arith.constant 0 : i32
    return %c0_i32, %c0_i32_0 : i32, i32
  }
  func.func @transform_3(%arg0: i32, %arg1: i32) -> (i32, i32, i32) {
    %c0_i32 = arith.constant 0 : i32
    %c0_i32_0 = arith.constant 0 : i32
    %c0_i32_1 = arith.constant 0 : i32
    %c0_i32_2 = arith.constant 0 : i32
    return %c0_i32, %c0_i32_0, %c0_i32_1 : i32, i32, i32
  }
  func.func @transform_4(%arg0: i32, %arg1: i32) -> (i32, i32) {
    %c0_i32 = arith.constant 0 : i32
    %c0_i32_0 = arith.constant 0 : i32
    %c0_i32_1 = arith.constant 0 : i32
    return %c0_i32, %c0_i32_0 : i32, i32
  }
  func.func @transform_5(%arg0: i32, %arg1: i32) -> (i32, i32) {
    %c0_i32 = arith.constant 0 : i32
    %c0_i32_0 = arith.constant 0 : i32
    %c0_i32_1 = arith.constant 0 : i32
    return %c0_i32, %c0_i32_0 : i32, i32
  }
  func.func @transform_6(%arg0: i32, %arg1: i32) -> (i32, i32) {
    %c0_i32 = arith.constant 0 : i32
    %c0_i32_0 = arith.constant 0 : i32
    %c0_i32_1 = arith.constant 0 : i32
    return %c0_i32, %c0_i32_0 : i32, i32
  }
  func.func @transform_7(%arg0: i32, %arg1: i32) -> (i32, i32, i32) {
    %c0_i32 = arith.constant 0 : i32
    %c0_i32_0 = arith.constant 0 : i32
    return %arg0, %arg1, %c0_i32 : i32, i32, i32
  }
}

</mosaic_0001>

<bundles_post_ra>
// kernel: residual_block_forward.1
= control target key start
LH: loop header
LB: loop body
LE: loop exit
PB: predicated region body
PF: predicated region fallthrough
CT: control target
= control target key end

     0   :  { %s2967_s24 = smov 0   ;;  %s2969_s25 = smov 0   ;;  %s3547_s0 = inlined_call_operand.vmem [shape: f32[4,28,9,4], index: 0, kind: input, shape index: {}]   ;;  %s3548_s1 = inlined_call_operand.vmem [shape: bf16[1,36,128], index: 1, kind: input, shape index: {}]   ;;  %s3549_s2 = inlined_call_operand.vmem [shape: f32[1,128], index: 2, kind: input, shape index: {}]   ;;  %s3550_s3 = inlined_call_operand.vmem [shape: bf16[3,384,128], index: 3, kind: input, shape index: {}]   ;;  %s3551_s4 = inlined_call_operand.vmem [shape: f32[1,128], index: 4, kind: input, shape index: {}]   ;;  %s3552_s5 = inlined_call_operand.vmem [shape: bf16[4,128], index: 5, kind: input, shape index: {}]   ;;  %s3553_s6 = inlined_call_operand.vmem [shape: f32[1,128], index: 6, kind: input, shape index: {}]   ;;  %s3554_s7 = inlined_call_operand.vmem [shape: f32[2,64,128], index: 7, kind: output, shape index: {}]  }
   0x1   :  { %s2971_s26 = smov 0   ;;  %s2973_s27 = smov 0  }
   0x2   :  { %s2975_s28 = smov 0  }
   0x3 LB: > { %s26_s29 = sadd.s32 1, %s2905_s26  ;;  %s29_s30 = sadd.s32 1, %s2909_s27  ;;  %s2913_s28 = sphi %s2975_s28, %s17_s28   ;;  %s2909_s27 = sphi %s2973_s27, %s3566_s27   ;;  %s2905_s26 = sphi %s2971_s26, %s3565_s26   ;;  %s2901_s25 = sphi %s2969_s25, %s3564_s25   ;;  %s2897_s24 = sphi %s2967_s24, %s3563_s24  }
   0x4   : > { %p27_p0 = scmp.ge.s32.totalorder %s26_s29, 2  ;;  %p2216_p1 = scmp.ge.s32.totalorder %s2913_s28, 1 }
   0x5   : > { %p259_p2 = scmp.lt.s32.totalorder %s2913_s28, 5 }
   0x6   : > { %s3568_s29 = smov (%p27_p0, %s26_s29), 0  ;;  %s3570_s30 = smov (!%p27_p0, %s29_s30), %s2909_s27 }
   0x7   : > { %p260_p3 = pnand %p2216_p1, %p259_p2  ;;  %p31_p4 = scmp.ge.s32.totalorder %s3570_s30, 2 }
   0x8   : > { %s2217_s8 = sshll.u32 (!%p260_p3), %s2901_s25, 1  ;;  %v2915_v0 = vmov (!%p260_p3), 0.0   ;;  %v2794_v1 = vld [vmem:[%s3548_s1] sm:$0xff] (!%p260_p3)   ;;  %v2795_v2 = vld [vmem:[%s3548_s1 + $0x8] sm:$0xff] (!%p260_p3)   ;;  %s2219_s15 = sshll.u32 (!%p260_p3), %s2897_s24, 2  ;;  %vm568_vm0 = vcmask (!%p260_p3), 1041408  }
   0x9   : > { %s3572_s30 = smov (%p31_p4, %s3570_s30), 0  ;;  %263 = sbr.rel (%p260_p3) target bundleno = 758 (0x2f6), region = 48 }
   0xa   : > { %s298_s9 = sadd.s32 (!%p260_p3), %s2897_s24, %s2217_s8  ;;  %2628 = vmatprep.subr.bf16.mxu0 (!%p260_p3), %v2915_v0  ;;  %p307_p6 = scmp.lt.s32.totalorder (!%p260_p3), %s2901_s25, 1  ;;  %v2796_v3 = vld [vmem:[%s3548_s1 + $0x10] ss:$0 sps:$4 sm:$0x33] (!%p260_p3)   ;;  %vm2917_vm1 = vmmov (!%p260_p3), 0   ;;  %vm475_vm2 = vcmask (!%p260_p3), 31744  }
   0xb   : > { %p299_p5 = scmp.lt.s32.totalorder (!%p260_p3), %s298_s9, 3  ;;  %2629 = vmatpush3.bf16.msra.mxu0 (!%p260_p3), %v2794_v1  ;;  %p309_p7 = scmp.lt.s32.totalorder (!%p260_p3), %s2219_s15, 7  ;;  %v570_v7 = vsel (!%p260_p3), %vm568_vm0, %v2796_v3, 0  ;;  %2634 = vmatprep.mubr.msk.bf16.mxu0 (!%p260_p3), %vm2917_vm1, %v2915_v0  ;;  %vm485_vm3 = vcmask (!%p260_p3), 64512   ;;  %vm492_vm4 = vcmask (!%p260_p3), 97280   ;;  %vm499_vm5 = vcmask (!%p260_p3), 130048  }
   0xc   : > { %2630 = vmatprep.subr.bf16.mxu0 (!%p260_p3), %v2915_v0  ;;  %s2916_s22 = smov (!%p260_p3), 4   ;;  %s2918_s8 = smov (!%p260_p3), 12   ;;  %vm506_vm6 = vcmask (!%p260_p3), 162816   ;;  %vm513_vm7 = vcmask (!%p260_p3), 195584   ;;  %vm520_vm8 = vcmask (!%p260_p3), 228352   ;;  %vm527_vm9 = vcmask (!%p260_p3), 261120  }
   0xd   : > { %s2919_s12 = smov (!%p260_p3), 8   ;;  %s2920_s13 = smov (!%p260_p3), 16   ;;  %vm561_vm10 = vcmask (!%p260_p3), 293888   ;;  %vm701_vm11 = vcmask (!%p260_p3), 1040384   ;;  %vm702_vm12 = vsmask.f32 (!%p260_p3), 256 }
   0xe   : > { %s2923_s16 = smov (!%p260_p3), 28   ;;  %s2924_s17 = smov (!%p260_p3), 32   ;;  %vm710_vm13 = vcmask (!%p260_p3), 1044480   ;;  %vm711_vm14 = vsmask.f32 (!%p260_p3), 4352  ;;  %vm3164_vm15 = vmand (!%p260_p3), %vm701_vm11, %vm702_vm12 }
   0xf   : > { %2631 = vmatpush3.bf16.msra.mxu0 (!%p260_p3), %v2795_v2  ;;  %p2289_p8 = scmp.ne.s32.totalorder (!%p260_p3), %s2897_s24, 0 }
  0x10   : > { %s3574_s9 = smov (!%p299_p5, %s298_s9), 3  ;;  %2632 = vmatprep.subr.bf16.mxu0 %v2915_v0  ;;  %s3576_s25 = smov (!%p307_p6, %s2901_s25), 1 }
  0x11   : > { %s2741_s14 = smul.u32 448, %s3574_s9  ;;  %s3578_s15 = smov (!%p309_p7, %s2219_s15), 7 }
  0x12   : > { %s2220_s21 = sshll.u32 %s3576_s25, 3 }
  0x13   : > { %s3019_s20 = scalar_lea.vmem %s3547_s0, %s2741_s14  ;;  %2633 = vmatpush3.bf16.msra.mxu0 %v570_v7  ;;  %s312_s23 = sadd.s32 %s2220_s21, %s3578_s15 }
  0x14   : > { %v2222_v4 = vld [vmem:[%s3019_s20 + $0x70] sm:$0xff]  ;;  %v2223_v5 = vld [vmem:[%s3019_s20 + $0x80] sm:$0xff]  ;;  %s2221_s25 = sshll.u32 %s312_s23, 3  ;;  %s2921_s14 = smov 20  }
  0x15   : > { %v2228_v6 = vld [vmem:[%s3019_s20 + $0xe0] sm:$0xff]  ;;  %v333_v8 = vpack.c.bf16 %v2223_v5, %v2222_v4  ;;  %v2229_v9 = vld [vmem:[%s3019_s20 + $0xf0] sm:$0xff]  ;;  %s3047_s11 = scalar_lea.vmem %s3554_s7, %s2221_s25  ;;  %s2922_s15 = smov 24  }
  0x16   : > { %v336_v10 = vld [vmem:[%s3019_s20 + $0x1] sm:$0xff]  ;;  %v337_v11 = vld [vmem:[%s3019_s20 + $0x11] sm:$0xff]  ;;  %v352_v12 = vpack.c.bf16 %v2229_v9, %v2228_v6 }
  0x17   : > { %v2234_v13 = vld [vmem:[%s3019_s20 + $0x150] sm:$0xff]  ;;  %v2235_v14 = vld [vmem:[%s3019_s20 + $0x160] sm:$0xff]  ;;  %406 = vrot.lane.b32.xlu0 %v333_v8, %s2916_s22  ;;  %v342_v15 = vpack.c.bf16 %v337_v11, %v336_v10 }
  0x18   : > { %424 = vrot.lane.b32.xlu1 %v352_v12, %s2918_s8  ;;  %v362_v16 = vpack.c.bf16 %v2235_v14, %v2234_v13  ;;  %v2240_v17 = vld [vmem:[%s3019_s20 + $0xe1] sm:$0xff]  ;;  %v2241_v18 = vld [vmem:[%s3019_s20 + $0xf1] sm:$0xff] }
  0x19   : > { %v3039_v19 = vld [vmem:[%s3019_s20 + $0x10] sm:$0xff]  ;;  %v3042_v20 = vld [vmem:[%s3019_s20 + $0x20] sm:$0xff]  ;;  %v371_v21 = vpack.c.bf16 %v2241_v18, %v2240_v17 }
  0x1a   : > { %v3051_v22 = vld [vmem:[%s3019_s20 + $0x30] sm:$0xff]  ;;  %v381_v23 = vpack.c.bf16 %v3042_v20, %v3039_v19  ;;  %v2259_v26 = vld [vmem:[%s3019_s20 + $0x21] sm:$0xff] }
  0x1b   : > { %415 = vrot.lane.b32.xlu0 %v342_v15, %s2919_s12  ;;  %v2253_v24 = vld [vmem:[%s3019_s20 + $0x90] sm:$0xff]  ;;  %v324_v25 = vpack.c.bf16 %v3051_v22, %v3042_v20  ;;  %v400_v28 = vpack.c.bf16 %v2259_v26, %v337_v11  ;;  %v2225_v29 = vld [vmem:[%s3019_s20 + $0xa0] sm:$0xff] }
  0x1c   : > { %433 = vrot.lane.b32.xlu1 %v362_v16, %s2920_s13  ;;  %v391_v27 = vpack.c.bf16 %v2253_v24, %v2223_v5  ;;  %v3064_v30 = vld [vmem:[%s3019_s20] sm:$0xff]  ;;  %v339_v31 = vld [vmem:[%s3019_s20 + $0x31] sm:$0xff]  ;;  %v334_v33 = vpack.c.bf16 %v2225_v29, %v2253_v24 }
  0x1d   : > { %v323_v32 = vpack.c.bf16 %v3039_v19, %v3064_v30  ;;  %v343_v34 = vpack.c.bf16 %v339_v31, %v2259_v26  ;;  %v2230_v35 = vld [vmem:[%s3019_s20 + $0x100] sm:$0xff]  ;;  %v2231_v36 = vld [vmem:[%s3019_s20 + $0x110] sm:$0xff] }
  0x1e   : > { %v2236_v37 = vld [vmem:[%s3019_s20 + $0x170] sm:$0xff]  ;;  %v2237_v38 = vld [vmem:[%s3019_s20 + $0x180] sm:$0xff]  ;;  %v353_v39 = vpack.c.bf16 %v2231_v36, %v2230_v35 }
  0x1f   : > { %442 = vrot.lane.b32.xlu0 %v371_v21, %s2921_s14  ;;  %v3077_v40 = vld [vmem:[%s3019_s20 + $0x40] sm:$0xff]  ;;  %v3080_v41 = vld [vmem:[%s3019_s20 + $0x50] sm:$0xff]  ;;  %v363_v42 = vpack.c.bf16 %v2237_v38, %v2236_v37 }
  0x20   : > { %451 = vrot.lane.b32.xlu1 %v381_v23, %s2922_s15  ;;  %v2242_v43 = vld [vmem:[%s3019_s20 + $0x101] sm:$0xff]  ;;  %v2243_v44 = vld [vmem:[%s3019_s20 + $0x111] sm:$0xff]  ;;  %v325_v45 = vpack.c.bf16 %v3080_v41, %v3077_v40  ;;  %v382_v47 = vpack.c.bf16 %v3077_v40, %v3051_v22 }
  0x21   : > { %v372_v46 = vpack.c.bf16 %v2243_v44, %v2242_v43  ;;  %v2255_v48 = vld [vmem:[%s3019_s20 + $0xb0] sm:$0xff]  ;;  %v2261_v49 = vld [vmem:[%s3019_s20 + $0x41] sm:$0xff] }
  0x22   : > { %v392_v50 = vpack.c.bf16 %v2255_v48, %v2225_v29  ;;  %v401_v51 = vpack.c.bf16 %v2261_v49, %v339_v31  ;;  %v2227_v52 = vld [vmem:[%s3019_s20 + $0xc0] sm:$0xff]  ;;  %v341_v53 = vld [vmem:[%s3019_s20 + $0x51] sm:$0xff] }
  0x23   : > { %460 = vrot.lane.b32.xlu0 %v391_v27, %s2923_s16  ;;  %v335_v54 = vpack.c.bf16 %v2227_v52, %v2255_v48  ;;  %v344_v55 = vpack.c.bf16 %v341_v53, %v2261_v49  ;;  %v2232_v56 = vld [vmem:[%s3019_s20 + $0x120] sm:$0xff]  ;;  %v2233_v57 = vld [vmem:[%s3019_s20 + $0x130] sm:$0xff] }
  0x24   : > { %469 = vrot.lane.b32.xlu1 %v400_v28, %s2924_s17  ;;  %v2238_v58 = vld [vmem:[%s3019_s20 + $0x190] sm:$0xff]  ;;  %v2239_v59 = vld [vmem:[%s3019_s20 + $0x1a0] sm:$0xff]  ;;  %v354_v60 = vpack.c.bf16 %v2233_v57, %v2232_v56 }
  0x25   : > { %v364_v61 = vpack.c.bf16 %v2239_v59, %v2238_v58  ;;  %v2244_v62 = vld [vmem:[%s3019_s20 + $0x121] sm:$0xff]  ;;  %v2245_v63 = vld [vmem:[%s3019_s20 + $0x131] sm:$0xff] }
  0x26   : > { %v2251_v1 = vld [vmem:[%s3019_s20 + $0x60] sm:$0xff]  ;;  %v373_v2 = vpack.c.bf16 %v2245_v63, %v2244_v62  ;;  %v2257_v4 = vld [vmem:[%s3019_s20 + $0xd0] sm:$0xff] }
  0x27   : > { %408 = vrot.lane.b32.xlu0 %v334_v33, %s2916_s22  ;;  %v383_v3 = vpack.c.bf16 %v2251_v1, %v3080_v41  ;;  %v2263_v5 = vld [vmem:[%s3019_s20 + $0x61] sm:$0xff]  ;;  %v393_v6 = vpack.c.bf16 %v2257_v4, %v2227_v52 }
  0x28   : > { %417 = vrot.lane.b32.xlu1 %v343_v34, %s2919_s12  ;;  %v402_v7 = vpack.c.bf16 %v2263_v5, %v341_v53 }
  0x2b   : > { %426 = vrot.lane.b32.xlu0 %v353_v39, %s2918_s8 }
  0x2c   : > { %435 = vrot.lane.b32.xlu1 %v363_v42, %s2920_s13 }
  0x2f   : > { %444 = vrot.lane.b32.xlu0 %v372_v46, %s2921_s14 }
  0x30   : > { %453 = vrot.lane.b32.xlu1 %v382_v47, %s2922_s15 }
  0x33   : > { %462 = vrot.lane.b32.xlu0 %v392_v50, %s2923_s16 }
  0x34   : > { %471 = vrot.lane.b32.xlu1 %v401_v51, %s2924_s17 }
  0x37   : > { %410 = vrot.lane.b32.xlu0 %v335_v54, %s2916_s22 }
  0x38   : > { %419 = vrot.lane.b32.xlu1 %v344_v55, %s2919_s12  ;;  %v3160_v55 = vld [vmem:[%s3549_s2] ss:$0 sm:$0xff] }
  0x3b   : > { %428 = vrot.lane.b32.xlu0 %v354_v60, %s2918_s8 }
  0x3c   : > { %437 = vrot.lane.b32.xlu1 %v364_v61, %s2920_s13 }
  0x3f   : > { %446 = vrot.lane.b32.xlu0 %v373_v2, %s2921_s14 }
  0x40   : > { %455 = vrot.lane.b32.xlu1 %v383_v3, %s2922_s15 }
  0x43   : > { %464 = vrot.lane.b32.xlu0 %v393_v6, %s2923_s16 }
  0x44   : > { %473 = vrot.lane.b32.xlu1 %v402_v7, %s2924_s17 }
  0x89   : > { %v407_v8 = vpop.permute.xlu0 %406 }
  0x8a   : > { %v425_v9 = vpop.permute.xlu1 %424  ;;  %v478_v10 = vsel %vm475_vm2, %v323_v32, %v407_v8 }
  0x8d   : > { %v416_v11 = vpop.permute.xlu0 %415 }
  0x8e   : > { %v487_v12 = vsel %vm485_vm3, %v478_v10, %v416_v11  ;;  %v434_v13 = vpop.permute.xlu1 %433 }
  0x8f   : > { %v494_v14 = vsel %vm492_vm4, %v487_v12, %v425_v9 }
  0x90   : > { %v501_v15 = vsel %vm499_vm5, %v494_v14, %v434_v13 }
  0x91   : > { %v443_v16 = vpop.permute.xlu0 %442 }
  0x92   : > { %v508_v17 = vsel %vm506_vm6, %v501_v15, %v443_v16  ;;  %v452_v18 = vpop.permute.xlu1 %451 }
  0x93   : > { %v515_v19 = vsel %vm513_vm7, %v508_v17, %v452_v18 }
  0x95   : > { %v461_v21 = vpop.permute.xlu0 %460 }
  0x96   : > { %v522_v23 = vsel %vm520_vm8, %v515_v19, %v461_v21  ;;  %v470_v24 = vpop.permute.xlu1 %469 }
  0x97   : > { %v529_v26 = vsel %vm527_vm9, %v522_v23, %v470_v24 }
  0x98   : > { %2635 = vmatmul.mubr.msk.bf16.vlgmr.msra.gmra.mrb[0].mxu0 %vm561_vm10, %v529_v26 }
  0x99   : > { %v409_v27 = vpop.permute.xlu0 %408  ;;  %2638 = vmatprep.mubr.msk.bf16.mxu0 %vm2917_vm1, %v2915_v0 }
  0x9a   : > { %v481_v28 = vsel %vm475_vm2, %v324_v25, %v409_v27  ;;  %v418_v29 = vpop.permute.xlu1 %417 }
  0x9b   : > { %v489_v30 = vsel %vm485_vm3, %v481_v28, %v418_v29 }
  0x9d   : > { %v427_v31 = vpop.permute.xlu0 %426 }
  0x9e   : > { %v496_v32 = vsel %vm492_vm4, %v489_v30, %v427_v31  ;;  %v436_v33 = vpop.permute.xlu1 %435 }
  0x9f   : > { %v503_v34 = vsel %vm499_vm5, %v496_v32, %v436_v33 }
  0xa1   : > { %v445_v35 = vpop.permute.xlu0 %444 }
  0xa2   : > { %v510_v36 = vsel %vm506_vm6, %v503_v34, %v445_v35  ;;  %v454_v37 = vpop.permute.xlu1 %453 }
  0xa3   : > { %v517_v38 = vsel %vm513_vm7, %v510_v36, %v454_v37 }
  0xa5   : > { %v463_v39 = vpop.permute.xlu0 %462 }
  0xa6   : > { %v524_v20 = vsel %vm520_vm8, %v517_v38, %v463_v39  ;;  %v472_v22 = vpop.permute.xlu1 %471 }
  0xa7   : > { %v531_v25 = vsel %vm527_vm9, %v524_v20, %v472_v22 }
  0xa8   : > { %2639 = vmatmul.mubr.msk.bf16.gmra.mrb[4].mxu0 %vm561_vm10, %v531_v25 }
  0xa9   : > { %v411_v42 = vpop.permute.xlu0 %410  ;;  %2642 = vmatprep.mubr.msk.bf16.mxu0 %vm2917_vm1, %v2915_v0  ;;  %vm3168_vm1 = vmand %vm710_vm13, %vm711_vm14 }
  0xaa   : > { %v484_v43 = vsel %vm475_vm2, %v325_v45, %v411_v42  ;;  %v420_v44 = vpop.permute.xlu1 %419 }
  0xab   : > { %v491_v46 = vsel %vm485_vm3, %v484_v43, %v420_v44 }
  0xad   : > { %v429_v47 = vpop.permute.xlu0 %428 }
  0xae   : > { %v498_v48 = vsel %vm492_vm4, %v491_v46, %v429_v47  ;;  %v438_v49 = vpop.permute.xlu1 %437 }
  0xaf   : > { %v505_v50 = vsel %vm499_vm5, %v498_v48, %v438_v49 }
  0xb1   : > { %v447_v51 = vpop.permute.xlu0 %446 }
  0xb2   : > { %v512_v52 = vsel %vm506_vm6, %v505_v50, %v447_v51  ;;  %v456_v53 = vpop.permute.xlu1 %455 }
  0xb3   : > { %v519_v0 = vsel %vm513_vm7, %v512_v52, %v456_v53 }
  0xb5   : > { %v465_v54 = vpop.permute.xlu0 %464 }
  0xb6   : > { %v526_v40 = vsel %vm520_vm8, %v519_v0, %v465_v54  ;;  %v474_v41 = vpop.permute.xlu1 %473 }
  0xb7   : > { %v533_v45 = vsel %vm527_vm9, %v526_v40, %v474_v41 }
  0xb8   : > { %2643 = vmatmul.mubr.msk.bf16.gmra.mrb[8].mxu0 %vm561_vm10, %v533_v45 }
 0x16b   : > { %v606_v56 = vpop.f32.mrb[0].mxu0 }
 0x16c   : > { %v607_v57 = vadd.f32 %v3160_v55, %v606_v56  ;;  %v2636_v58 = vpop.f32.mrb[1].mxu0 }
 0x16d   : > { %v609_v59 = vpop.f32.mrb[2].mxu0 }
 0x16e   : > { %v629_v60 = vmax.f32 %v607_v57, 0.0  ;;  %v610_v61 = vadd.f32 %v3160_v55, %v609_v59  ;;  %v2637_v62 = vpop.f32.mrb[3].mxu0 }
 0x170   : > { %v2499_v63 = vpack.c.bf16 %v629_v60, %v629_v60  ;;  %v630_v1 = vmax.f32 %v610_v61, 0.0 }
 0x172   : > { %v654_v2 = vshrl.u32 %v2499_v63, 16  ;;  %v2500_v3 = vpack.c.bf16 %v630_v1, %v630_v1  ;;  %v657_v5 = vshll.u32 %v2499_v63, 16 }
 0x174   : > { %v656_v4 = vrot.slane %v654_v2, 7  ;;  %v661_v6 = vshrl.u32 %v2500_v3, 16  ;;  %v664_v11 = vshll.u32 %v2500_v3, 16 }
 0x176   : > { %v659_v8 = vor.u32 %v657_v5, %v656_v4  ;;  %v663_v10 = vrot.slane %v661_v6, 7 }
 0x178   : > { %v704_v12 = vsel %vm3164_vm15, 0, %v659_v8  ;;  %v666_v13 = vor.u32 %v664_v11, %v663_v10  ;;  %v2925_v11 = vmov (!%p2289_p8), 0  }
 0x179   : > { %v713_v14 = vsel %vm3168_vm1, %v704_v12, 0 }
 0x17a   : > { %v2277_v15 = vcombine.low %v713_v14, %v713_v14  ;;  %v2278_v16 = vcombine.high %v713_v14, %v713_v14  ;;  %v705_v17 = vsel %vm3164_vm15, 0, %v666_v13 }
 0x17b   : > { %v714_v18 = vsel %vm3168_vm1, %v705_v17, 0  ;;  %v614_v19 = vpop.f32.mrb[4].mxu0 }
 0x17c   : > { %761 = vst [vmem:[#allocation2] sm:$0xf] %v2277_v15  ;;  %762 = vst [vmem:[#allocation2 + $0x4] sm:$0x1] %v2278_v16  ;;  %v2279_v21 = vcombine.low %v714_v18, %v714_v18  ;;  %v2280_v23 = vcombine.high %v714_v18, %v714_v18  ;;  %v615_v24 = vadd.f32 %v3160_v55, %v614_v19  ;;  %v2640_v26 = vpop.f32.mrb[5].mxu0 }
 0x17d   : > { %v617_v27 = vpop.f32.mrb[6].mxu0  ;;  %777 = vst [vmem:[#allocation2] sm:$0xf] (!%p2289_p8), %v2925_v11  ;;  %778 = vst [vmem:[#allocation2 + $0x4] sm:$0x1] (!%p2289_p8), %v2925_v11 }
 0x17e   : > { %763 = vst [vmem:[#allocation2 + $0x8] sm:$0xf] %v2279_v21  ;;  %764 = vst [vmem:[#allocation2 + $0xc] sm:$0x1] %v2280_v23  ;;  %v631_v28 = vmax.f32 %v615_v24, 0.0  ;;  %v618_v29 = vadd.f32 %v3160_v55, %v617_v27  ;;  %v2641_v30 = vpop.f32.mrb[7].mxu0 }
 0x180   : > { %v2501_v31 = vpack.c.bf16 %v631_v28, %v631_v28  ;;  %v632_v32 = vmax.f32 %v618_v29, 0.0 }
 0x182   : > { %v668_v33 = vshrl.u32 %v2501_v31, 16  ;;  %v2502_v34 = vpack.c.bf16 %v632_v32, %v632_v32  ;;  %v671_v36 = vshll.u32 %v2501_v31, 16 }
 0x184   : > { %v670_v35 = vrot.slane %v668_v33, 7  ;;  %v675_v37 = vshrl.u32 %v2502_v34, 16  ;;  %v678_v20 = vshll.u32 %v2502_v34, 16 }
 0x186   : > { %v673_v38 = vor.u32 %v671_v36, %v670_v35  ;;  %v677_v39 = vrot.slane %v675_v37, 7 }
 0x188   : > { %v706_v22 = vsel %vm3164_vm15, 0, %v673_v38  ;;  %v680_v25 = vor.u32 %v678_v20, %v677_v39 }
 0x189   : > { %v715_v42 = vsel %vm3168_vm1, %v706_v22, 0 }
 0x18a   : > { %v2281_v43 = vcombine.low %v715_v42, %v715_v42  ;;  %v2282_v44 = vcombine.high %v715_v42, %v715_v42  ;;  %v707_v46 = vsel %vm3164_vm15, 0, %v680_v25 }
 0x18b   : > { %v716_v47 = vsel %vm3168_vm1, %v707_v46, 0  ;;  %v622_v48 = vpop.f32.mrb[8].mxu0 }
 0x18c   : > { %765 = vst [vmem:[#allocation2 + $0x10] sm:$0xf] %v2281_v43  ;;  %766 = vst [vmem:[#allocation2 + $0x14] sm:$0x1] %v2282_v44  ;;  %v2283_v49 = vcombine.low %v716_v47, %v716_v47  ;;  %v2284_v50 = vcombine.high %v716_v47, %v716_v47  ;;  %v623_v51 = vadd.f32 %v3160_v55, %v622_v48  ;;  %v2644_v52 = vpop.f32.mrb[9].mxu0 }
 0x18d   : > { %v625_v53 = vpop.f32.mrb[10].mxu0 }
 0x18e   : > { %767 = vst [vmem:[#allocation2 + $0x18] sm:$0xf] %v2283_v49  ;;  %768 = vst [vmem:[#allocation2 + $0x1c] sm:$0x1] %v2284_v50  ;;  %v633_v0 = vmax.f32 %v623_v51, 0.0  ;;  %v626_v54 = vadd.f32 %v3160_v55, %v625_v53  ;;  %v2645_v40 = vpop.f32.mrb[11].mxu0 }
 0x190   : > { %v2503_v41 = vpack.c.bf16 %v633_v0, %v633_v0  ;;  %v634_v45 = vmax.f32 %v626_v54, 0.0 }
 0x192   : > { %v682_v56 = vshrl.u32 %v2503_v41, 16  ;;  %v2504_v57 = vpack.c.bf16 %v634_v45, %v634_v45  ;;  %v685_v59 = vshll.u32 %v2503_v41, 16 }
 0x194   : > { %v684_v58 = vrot.slane %v682_v56, 7  ;;  %v689_v60 = vshrl.u32 %v2504_v57, 16  ;;  %v692_v63 = vshll.u32 %v2504_v57, 16 }
 0x196   : > { %v687_v61 = vor.u32 %v685_v59, %v684_v58  ;;  %v691_v62 = vrot.slane %v689_v60, 7 }
 0x198   : > { %v708_v1 = vsel %vm3164_vm15, 0, %v687_v61  ;;  %v694_v2 = vor.u32 %v692_v63, %v691_v62  ;;  %776 = sbr.rel (%p2289_p8) target bundleno = 415 (0x19f), region = 52 }
 0x199   : > { %v717_v3 = vsel %vm3168_vm1, %v708_v1, 0 }
 0x19a   : > { %v2285_v4 = vcombine.low %v717_v3, %v717_v3  ;;  %v2286_v55 = vcombine.high %v717_v3, %v717_v3  ;;  %v709_v5 = vsel %vm3164_vm15, 0, %v694_v2 }
 0x19b   : > { %v718_v6 = vsel %vm3168_vm1, %v709_v5, 0 }
 0x19c   : > { %769 = vst [vmem:[#allocation2 + $0x20] sm:$0xf] %v2285_v4  ;;  %770 = vst [vmem:[#allocation2 + $0x24] sm:$0x1] %v2286_v55  ;;  %v2287_v8 = vcombine.low %v718_v6, %v718_v6  ;;  %v2288_v10 = vcombine.high %v718_v6, %v718_v6 }
 0x19e   : > { %771 = vst [vmem:[#allocation2 + $0x28] sm:$0xf] %v2287_v8  ;;  %772 = vst [vmem:[#allocation2 + $0x2c] sm:$0x1] %v2288_v10 }
 0x19f PF: > { %p2290_p9 = scmp.ne.s32.totalorder %s2897_s24, 1 }
 0x1a0   : > { %v2926_v7 = vmov (!%p2290_p9), 0  }
 0x1a1   : > { %782 = sbr.rel (%p2290_p9) target bundleno = 424 (0x1a8), region = 56  ;;  %784 = vst [vmem:[#allocation2 + $0x28] sm:$0xf] (!%p2290_p9), %v2926_v7  ;;  %785 = vst [vmem:[#allocation2 + $0x2c] sm:$0x1] (!%p2290_p9), %v2926_v7 }
 0x1a8 PF: > { %v2797_v9 = vld [vmem:[%s3550_s3 + $0x100] sm:$0xff]   ;;  %v2800_v14 = vld [vmem:[%s3550_s3 + $0x108] sm:$0xff]   ;;  %v2803_v17 = vld [vmem:[%s3550_s3 + $0x110] sm:$0xff]   ;;  %vm865_vm3 = vcmask 1042432   ;;  %vm866_vm4 = vcmask 1046532  }
 0x1a9   : > { %v2798_v12 = vld [vmem:[%s3550_s3 + $0x140] sm:$0xff]   ;;  %2511 = vmatprep.subr.bf16.mxu1 %v2797_v9  ;;  %v2801_v15 = vld [vmem:[%s3550_s3 + $0x148] sm:$0xff]   ;;  %v2804_v18 = vld [vmem:[%s3550_s3 + $0x150] sm:$0xff]   ;;  %vm794_vm5 = vsmask.f32 3328 }
 0x1aa   : > { %v2799_v13 = vld [vmem:[%s3550_s3 + $0xc0] sm:$0xff]   ;;  %2646 = vmatprep.subr.bf16.mxu0 %v2798_v12  ;;  %v2802_v16 = vld [vmem:[%s3550_s3 + $0xc8] sm:$0xff]   ;;  %v2805_v19 = vld [vmem:[%s3550_s3 + $0xd0] sm:$0xff]   ;;  %vm795_vm6 = vsmask.f32 7440 }
 0x1ab   : > { %2512 = vmatpush3.bf16.msra.mxu1 %v2799_v13  ;;  %2647 = vmatpush3.bf16.msra.mxu0 %v2798_v12  ;;  %v2806_v21 = vld [vmem:[%s3550_s3 + $0x118] sm:$0xff]   ;;  %v2809_v26 = vld [vmem:[%s3550_s3 + $0x120] sm:$0xff]   ;;  %v2812_v29 = vld [vmem:[%s3550_s3 + $0x128] sm:$0xff]  }
 0x1ac   : > { %2513 = vmatprep.subr.bf16.mxu1 %v2800_v14  ;;  %2648 = vmatprep.subr.bf16.mxu0 %v2801_v15  ;;  %v2807_v23 = vld [vmem:[%s3550_s3 + $0x158] sm:$0xff]   ;;  %v2810_v27 = vld [vmem:[%s3550_s3 + $0x160] sm:$0xff]   ;;  %v2813_v30 = vld [vmem:[%s3550_s3 + $0x168] sm:$0xff]  }
 0x1ad   : > { %v2808_v24 = vld [vmem:[%s3550_s3 + $0xd8] sm:$0xff]   ;;  %v2811_v28 = vld [vmem:[%s3550_s3 + $0xe0] sm:$0xff]   ;;  %v2814_v31 = vld [vmem:[%s3550_s3 + $0xe8] sm:$0xff]  }
 0x1ae   : > { %v2815_v32 = vld [vmem:[%s3550_s3 + $0x130] sm:$0xff]   ;;  %v2818_v35 = vld [vmem:[%s3550_s3 + $0x138] sm:$0xff]   ;;  %v3271_v37 = vld [vmem:[#allocation2 + $0x8] sm:$0xf] }
 0x1af   : > { %2514 = vmatpush3.bf16.msra.mxu1 %v2802_v16  ;;  %2649 = vmatpush3.bf16.msra.mxu0 %v2801_v15  ;;  %v2816_v33 = vld [vmem:[%s3550_s3 + $0x170] sm:$0xff]   ;;  %v2819_v36 = vld [vmem:[%s3550_s3 + $0x178] sm:$0xff]   ;;  %v965_v39 = vld [vmem:[#allocation2 + $0xc] sm:$0x1]  ;;  %v970_v20 = vshrl.u32 %v3271_v37, 16  ;;  %v973_v22 = vshll.u32 %v3271_v37, 16 }
 0x1b0   : > { %2515 = vmatprep.subr.bf16.mxu1 %v2803_v17  ;;  %2650 = vmatprep.subr.bf16.mxu0 %v2804_v18  ;;  %v2817_v34 = vld [vmem:[%s3550_s3 + $0xf0] sm:$0xff]   ;;  %v2820_v25 = vld [vmem:[%s3550_s3 + $0xf8] sm:$0xff]   ;;  %v979_v43 = vshll.u32 %v965_v39, 16  ;;  %vm3280_vm7 = vmor %vm865_vm3, %vm866_vm4  ;;  %v1039_v52 = vrot.slane %v965_v39, 5 }
 0x1b1   : > { %v962_v38 = vld [vmem:[#allocation2 + $0x10] sm:$0xf]  ;;  %v966_v42 = vld [vmem:[#allocation2 + $0x14] sm:$0x1]  ;;  %v972_v47 = vrot.slane %v970_v20, 4  ;;  %v975_v48 = vrot.slane %v973_v22, 5  ;;  %vm3289_vm8 = vmor %vm794_vm5, %vm795_vm6 }
 0x1b2   : > { %v984_v44 = vshrl.u32 %v962_v38, 16  ;;  %v987_v46 = vshll.u32 %v962_v38, 16  ;;  %v993_v49 = vshll.u32 %v966_v42, 16  ;;  %v1025_v51 = vld [vmem:[#allocation2 + $0x8] sm:$0xe]  ;;  %v2822_v53 = vld [vmem:[%s3550_s3 + $0x40] sm:$0xff]   ;;  %v2305_v15 = vcombine.low %v3271_v37, %v962_v38 }
 0x1b3   : > { %2516 = vmatpush3.bf16.msra.mxu1 %v2805_v19  ;;  %2651 = vmatpush3.bf16.msra.mxu0 %v2804_v18  ;;  %v981_v0 = vrot.slane %v979_v43, 5  ;;  %v1026_v41 = vld [vmem:[#allocation2 + $0x10] sm:$0xe]  ;;  %v2301_v45 = vrot.slane %v1025_v51, 9  ;;  %v976_v57 = vor.u32 %v975_v48, %v972_v47  ;;  %v1043_v60 = vrot.slane %v966_v42, 5  ;;  %v2823_v61 = vld [vmem:[%s3550_s3 + $0x80] sm:$0xff]  }
 0x1b4   : > { %2517 = vmatprep.subr.bf16.mxu1 %v2806_v21  ;;  %2652 = vmatprep.subr.bf16.mxu0 %v2807_v23  ;;  %v986_v54 = vrot.slane %v984_v44, 4  ;;  %v989_v40 = vrot.slane %v987_v46, 5  ;;  %v995_v58 = vrot.slane %v993_v49, 5  ;;  %v2302_v59 = vrot.slane %v1026_v41, 9  ;;  %v3300_v3 = vld [vmem:[#allocation2 + $0x1c] sm:$0x1] }
 0x1b5   : > { %v1040_v63 = vsel %vm3280_vm7, %v2301_v45, %v1039_v52  ;;  %v977_v1 = vrot.slane %v976_v57, 4  ;;  %v3302_v4 = vld [vmem:[#allocation2 + $0x24] sm:$0x1]  ;;  %v1027_v6 = vld [vmem:[#allocation2 + $0x18] sm:$0xe]  ;;  %v1047_v10 = vrot.slane %v3300_v3, 5 }
 0x1b6   : > { %v990_v62 = vor.u32 %v989_v40, %v986_v54  ;;  %v1044_v2 = vsel %vm3280_vm7, %v2302_v59, %v1043_v60  ;;  %v1028_v8 = vld [vmem:[#allocation2 + $0x20] sm:$0xe]  ;;  %v2303_v7 = vrot.slane %v1027_v6, 9  ;;  %v1051_v12 = vrot.slane %v3302_v4, 5  ;;  %v2825_v19 = vld [vmem:[%s3550_s3 + $0x48] sm:$0xff]   ;;  %v2841_v41 = vld [vmem:[%s3550_s3 + $0x70] sm:$0xff]  }
 0x1b7   : > { %2518 = vmatpush3.bf16.msra.mxu1 %v2808_v24  ;;  %2653 = vmatpush3.bf16.msra.mxu0 %v2807_v23  ;;  %v2309_v5 = vcombine.low %v1040_v63, %v1044_v2  ;;  %v982_v11 = vsel %vm3289_vm8, %v977_v1, %v981_v0  ;;  %v2304_v9 = vrot.slane %v1028_v8, 9  ;;  %v2824_v13 = vld [vmem:[%s3550_s3] sm:$0xff]   ;;  %v2826_v23 = vld [vmem:[%s3550_s3 + $0x88] sm:$0xff]   ;;  %v2842_v45 = vld [vmem:[%s3550_s3 + $0xb0] sm:$0xff]  }
 0x1b8   : > { %2519 = vmatprep.subr.bf16.mxu1 %v2809_v26  ;;  %2654 = vmatprep.subr.bf16.mxu0 %v2810_v27  ;;  %v991_v55 = vrot.slane %v990_v62, 4  ;;  %v1048_v17 = vsel %vm3280_vm7, %v2303_v7, %v1047_v10  ;;  %v2827_v24 = vld [vmem:[%s3550_s3 + $0x8] sm:$0xff]   ;;  %v2828_v26 = vld [vmem:[%s3550_s3 + $0x50] sm:$0xff]   ;;  %v964_v37 = vld [vmem:[#allocation2 + $0x20] sm:$0xf] }
 0x1b9   : > { %2662 = vmatprep.mubr.bf16.mxu0 %v2309_v5  ;;  %v1052_v18 = vsel %vm3280_vm7, %v2304_v9, %v1051_v12  ;;  %v1012_v20 = vshrl.u32 %v964_v37, 16  ;;  %v1015_v22 = vshll.u32 %v964_v37, 16  ;;  %v2837_v42 = vld [vmem:[%s3550_s3 + $0x68] sm:$0xff]   ;;  %v3371_v57 = vld [vmem:[#allocation2] sm:$0xf]  ;;  %v2845_v8 = vld [vmem:[%s3550_s3 + $0xb8] sm:$0xff]  }
 0x1ba   : > { %v996_v14 = vsel %vm3289_vm8, %v991_v55, %v995_v58  ;;  %v2310_v21 = vcombine.low %v1048_v17, %v1052_v18  ;;  %v2838_v43 = vld [vmem:[%s3550_s3 + $0xa8] sm:$0xff]   ;;  %v790_v63 = vld [vmem:[#allocation2 + $0x4] sm:$0x1]  ;;  %v801_v55 = vshll.u32 %v3371_v57, 16  ;;  %v853_v6 = vld [vmem:[#allocation2] sm:$0xe] }
 0x1bb   : > { %2520 = vmatpush3.bf16.msra.mxu1 %v2811_v28  ;;  %2655 = vmatpush3.bf16.msra.mxu0 %v2810_v27  ;;  %v2307_v16 = vcombine.low %v982_v11, %v996_v14  ;;  %v2829_v27 = vld [vmem:[%s3550_s3 + $0x90] sm:$0xff]   ;;  %v1014_v47 = vrot.slane %v1012_v20, 4  ;;  %v1017_v48 = vrot.slane %v1015_v22, 5  ;;  %v2839_v0 = vld [vmem:[%s3550_s3 + $0x28] sm:$0xff]   ;;  %v807_v5 = vshll.u32 %v790_v63, 16  ;;  %v2849_v20 = vld [vmem:[%s3550_s3 + $0x200] sm:$0xff]  }
 0x1bc   : > { %2521 = vmatprep.subr.bf16.mxu1 %v2812_v29  ;;  %2656 = vmatprep.subr.bf16.mxu0 %v2813_v30  ;;  %v2830_v28 = vld [vmem:[%s3550_s3 + $0x10] sm:$0xff]   ;;  %v2831_v29 = vld [vmem:[%s3550_s3 + $0x58] sm:$0xff]   ;;  %v3380_v62 = vld [vmem:[#allocation2 + $0x8] sm:$0xf] }
 0x1bd   : > { %1306 = vmatprep.mubr.bf16.mxu1 %v2307_v16  ;;  %v1018_v52 = vor.u32 %v1017_v48, %v1014_v47  ;;  %v791_v1 = vld [vmem:[#allocation2 + $0xc] sm:$0x1]  ;;  %v812_v10 = vshrl.u32 %v3380_v62, 16  ;;  %v815_v11 = vshll.u32 %v3380_v62, 16  ;;  %v854_v9 = vld [vmem:[#allocation2 + $0x8] sm:$0xe]  ;;  %v2295_v47 = vcombine.low %v3371_v57, %v3380_v62 }
 0x1be   : > { %v821_v7 = vshll.u32 %v791_v1, 16  ;;  %v809_v14 = vrot.slane %v807_v5, 5  ;;  %v2846_v16 = vld [vmem:[%s3550_s3 + $0x38] sm:$0xff]  }
 0x1bf   : > { %2522 = vmatpush3.bf16.msra.mxu1 %v2814_v31  ;;  %2657 = vmatpush3.bf16.msra.mxu0 %v2813_v30  ;;  %v2832_v30 = vld [vmem:[%s3550_s3 + $0x98] sm:$0xff]   ;;  %v1019_v40 = vrot.slane %v1018_v52, 4  ;;  %v814_v17 = vrot.slane %v812_v10, 4  ;;  %v817_v18 = vrot.slane %v815_v11, 5 }
 0x1c0   : > { %2523 = vmatprep.subr.bf16.mxu1 %v2815_v32  ;;  %2658 = vmatprep.subr.bf16.mxu0 %v2816_v33  ;;  %v2833_v31 = vld [vmem:[%s3550_s3 + $0x18] sm:$0xff]   ;;  %v2834_v32 = vld [vmem:[%s3550_s3 + $0x60] sm:$0xff]  }
 0x1c1   : > { %v2859_v10 = vld [vmem:[%s3550_s3 + $0x218] sm:$0xff]  }
 0x1c3   : > { %2524 = vmatpush3.bf16.msra.mxu1 %v2817_v34  ;;  %2659 = vmatpush3.bf16.msra.mxu0 %v2816_v33  ;;  %v1007_v33 = vshll.u32 %v3300_v3, 16  ;;  %v2835_v34 = vld [vmem:[%s3550_s3 + $0xa0] sm:$0xff]   ;;  %v2844_v3 = vld [vmem:[%s3550_s3 + $0x78] sm:$0xff]  }
 0x1c4   : > { %2525 = vmatprep.subr.bf16.mxu1 %v2818_v35  ;;  %2660 = vmatprep.subr.bf16.mxu0 %v2819_v36  ;;  %v1021_v35 = vshll.u32 %v3302_v4, 16  ;;  %v798_v4 = vshrl.u32 %v3371_v57, 16 }
 0x1c5   : > { %v1009_v51 = vrot.slane %v1007_v33, 5 }
 0x1c6   : > { %v800_v12 = vrot.slane %v798_v4, 4  ;;  %v2855_v4 = vld [vmem:[%s3550_s3 + $0x1d0] sm:$0xff]  }
 0x1c7   : > { %2526 = vmatpush3.bf16.msra.mxu1 %v2820_v25  ;;  %2661 = vmatpush3.bf16.msra.mxu0 %v2819_v36  ;;  %v963_v36 = vld [vmem:[#allocation2 + $0x18] sm:$0xf]  ;;  %v2836_v25 = vld [vmem:[%s3550_s3 + $0x20] sm:$0xff]  }
 0x1c8   : > { %2549 = vmatprep.subr.bf16.mxu1 %v2822_v53  ;;  %2666 = vmatprep.subr.bf16.mxu0 %v2823_v61  ;;  %v998_v38 = vshrl.u32 %v963_v36, 16  ;;  %v1001_v39 = vshll.u32 %v963_v36, 16  ;;  %v1023_v53 = vrot.slane %v1021_v35, 5  ;;  %v2306_v60 = vcombine.low %v963_v36, %v964_v37  ;;  %v856_v35 = vld [vmem:[#allocation2 + $0x18] sm:$0xe] }
 0x1c9   : > { %v2294_v22 = vrot.slane %v856_v35, 9 }
 0x1ca   : > { %1307 = vmatmul.mubr.bf16.vlgmr.msra.gmra.mrb[0].mxu1 %v2305_v15  ;;  %2663 = vmatmul.mubr.bf16.vlgmr.msra.gmra.mrb[12].mxu0 %v2310_v21  ;;  %v1000_v44 = vrot.slane %v998_v38, 4  ;;  %v1003_v46 = vrot.slane %v1001_v39, 5  ;;  %v1024_v59 = vsel %vm3289_vm8, %v1019_v40, %v1023_v53  ;;  %v2291_v15 = vrot.slane %v853_v6, 9  ;;  %v2852_v53 = vld [vmem:[%s3550_s3 + $0x208] sm:$0xff]  }
 0x1cb   : > { %2550 = vmatpush3.bf16.msra.mxu1 %v2824_v13  ;;  %2667 = vmatpush3.bf16.msra.mxu0 %v2823_v61  ;;  %v2843_v61 = vld [vmem:[%s3550_s3 + $0x30] sm:$0xff]   ;;  %v803_v13 = vrot.slane %v801_v55, 5  ;;  %v870_v21 = vrot.slane %v790_v63, 5 }
 0x1cc   : > { %2551 = vmatprep.subr.bf16.mxu1 %v2825_v19  ;;  %2668 = vmatprep.subr.bf16.mxu0 %v2826_v23  ;;  %v1004_v49 = vor.u32 %v1003_v46, %v1000_v44  ;;  %v823_v19 = vrot.slane %v821_v7, 5  ;;  %v2850_v44 = vld [vmem:[%s3550_s3 + $0x180] sm:$0xff]  }
 0x1ce   : > { %v1005_v54 = vrot.slane %v1004_v49, 4  ;;  %v2851_v49 = vld [vmem:[%s3550_s3 + $0x1c8] sm:$0xff]  }
 0x1cf   : > { %2552 = vmatpush3.bf16.msra.mxu1 %v2827_v24  ;;  %2669 = vmatpush3.bf16.msra.mxu0 %v2826_v23  ;;  %v804_v23 = vor.u32 %v803_v13, %v800_v12  ;;  %v2292_v24 = vrot.slane %v854_v9, 9  ;;  %v2858_v9 = vld [vmem:[%s3550_s3 + $0x1d8] sm:$0xff]  }
 0x1d0   : > { %2553 = vmatprep.subr.bf16.mxu1 %v2828_v26  ;;  %2670 = vmatprep.subr.bf16.mxu0 %v2829_v27  ;;  %v1010_v58 = vsel %vm3289_vm8, %v1005_v54, %v1009_v51  ;;  %v874_v26 = vrot.slane %v791_v1, 5  ;;  %v789_v54 = vld [vmem:[#allocation2 + $0x18] sm:$0xf] }
 0x1d1   : > { %v2308_v2 = vcombine.low %v1010_v58, %v1024_v59  ;;  %v840_v59 = vshrl.u32 %v789_v54, 16 }
 0x1d2   : > { %v875_v33 = vsel %vm3280_vm7, %v2292_v24, %v874_v26  ;;  %v2866_v24 = vld [vmem:[%s3550_s3 + $0x1a8] sm:$0xff]   ;;  %v2868_v26 = vld [vmem:[%s3550_s3 + $0x230] sm:$0xff]  }
 0x1d3   : > { %2554 = vmatpush3.bf16.msra.mxu1 %v2830_v28  ;;  %2671 = vmatpush3.bf16.msra.mxu0 %v2829_v27  ;;  %v818_v27 = vor.u32 %v817_v18, %v814_v17  ;;  %v871_v28 = vsel %vm3280_vm7, %v2291_v15, %v870_v21  ;;  %v842_v1 = vrot.slane %v840_v59, 4  ;;  %v2862_v17 = vld [vmem:[%s3550_s3 + $0x220] sm:$0xff]   ;;  %v2865_v21 = vld [vmem:[%s3550_s3 + $0x228] sm:$0xff]  }
 0x1d4   : > { %2555 = vmatprep.subr.bf16.mxu1 %v2831_v29  ;;  %2672 = vmatprep.subr.bf16.mxu0 %v2832_v30  ;;  %v792_v29 = vld [vmem:[#allocation2 + $0x14] sm:$0x1]  ;;  %v2299_v39 = vcombine.low %v871_v28, %v875_v33  ;;  %v2861_v18 = vld [vmem:[%s3550_s3 + $0x1e0] sm:$0xff]   ;;  %v3473_v28 = vld [vmem:[#allocation2 + $0x10] sm:$0xf] }
 0x1d5   : > { %1314 = vmatprep.mubr.bf16.mxu1 %v2308_v2  ;;  %v878_v37 = vrot.slane %v792_v29, 5  ;;  %v819_v38 = vrot.slane %v818_v27, 4  ;;  %v835_v40 = vshll.u32 %v792_v29, 16  ;;  %v2867_v27 = vld [vmem:[%s3550_s3 + $0x1f0] sm:$0xff]   ;;  %v3475_v29 = vld [vmem:[#allocation2 + $0x18] sm:$0xf] }
 0x1d6   : > { %1315 = vmatmul.mubr.bf16.gmra.mrb[4].mxu1 %v2306_v60  ;;  %2682 = vmatprep.mubr.bf16.mxu0 %v2299_v39  ;;  %v843_v60 = vshll.u32 %v789_v54, 16  ;;  %v1620_v33 = vld [vmem:[#allocation2 + $0x1c] sm:$0x1]  ;;  %v1627_v35 = vshll.u32 %v3473_v28, 16  ;;  %v1641_v39 = vshll.u32 %v3475_v29, 16 }
 0x1d7   : > { %2556 = vmatpush3.bf16.msra.mxu1 %v2833_v31  ;;  %2673 = vmatpush3.bf16.msra.mxu0 %v2832_v30  ;;  %v793_v30 = vld [vmem:[#allocation2 + $0x1c] sm:$0x1]  ;;  %v855_v31 = vld [vmem:[#allocation2 + $0x10] sm:$0xe]  ;;  %v824_v46 = vsel %vm3289_vm8, %v819_v38, %v823_v19  ;;  %v2863_v19 = vld [vmem:[%s3550_s3 + $0x1a0] sm:$0xff]   ;;  %v1638_v38 = vshrl.u32 %v3475_v29, 16 }
 0x1d8   : > { %2557 = vmatprep.subr.bf16.mxu1 %v2834_v32  ;;  %2674 = vmatprep.subr.bf16.mxu0 %v2835_v34  ;;  %v805_v32 = vrot.slane %v804_v23, 4  ;;  %v2293_v36 = vrot.slane %v855_v31, 9  ;;  %v845_v2 = vrot.slane %v843_v60, 5  ;;  %v2864_v23 = vld [vmem:[%s3550_s3 + $0x1e8] sm:$0xff]   ;;  %v2871_v31 = vld [vmem:[%s3550_s3 + $0x238] sm:$0xff]  }
 0x1da   : > { %v846_v5 = vor.u32 %v845_v2, %v842_v1 }
 0x1db   : > { %2558 = vmatpush3.bf16.msra.mxu1 %v2836_v25  ;;  %2675 = vmatpush3.bf16.msra.mxu0 %v2835_v34  ;;  %v2848_v34 = vld [vmem:[%s3550_s3 + $0x1c0] sm:$0xff]   ;;  %v882_v25 = vrot.slane %v793_v30, 5 }
 0x1dc   : > { %2559 = vmatprep.subr.bf16.mxu1 %v2837_v42  ;;  %2676 = vmatprep.subr.bf16.mxu0 %v2838_v43  ;;  %v810_v42 = vsel %vm3289_vm8, %v805_v32, %v809_v14  ;;  %v847_v7 = vrot.slane %v846_v5, 4  ;;  %v1619_v32 = vld [vmem:[#allocation2 + $0x14] sm:$0x1]  ;;  %v2411_v5 = vcombine.low %v3473_v28, %v3475_v29 }
 0x1dd   : > { %v883_v48 = vsel %vm3280_vm7, %v2294_v22, %v882_v25  ;;  %v2297_v51 = vcombine.low %v810_v42, %v824_v46  ;;  %v1679_v22 = vld [vmem:[#allocation2 + $0x10] sm:$0xe]  ;;  %v1629_v42 = vrot.slane %v1627_v35, 5  ;;  %v1693_v46 = vrot.slane %v1619_v32, 5 }
 0x1de   : > { %v2491_v35 = vld [vmem:[%s3019_s20 + $0x170] sm:$0xff] }
 0x1df   : > { %2560 = vmatpush3.bf16.msra.mxu1 %v2839_v0  ;;  %2677 = vmatpush3.bf16.msra.mxu0 %v2838_v43  ;;  %v879_v43 = vsel %vm3280_vm7, %v2293_v36, %v878_v37  ;;  %v788_v0 = vld [vmem:[#allocation2 + $0x10] sm:$0xf]  ;;  %v2870_v36 = vld [vmem:[%s3550_s3 + $0x1f8] sm:$0xff]   ;;  %v1633_v37 = vshll.u32 %v1619_v32, 16 }
 0x1e0   : > { %2561 = vmatprep.subr.bf16.mxu1 %v2841_v41  ;;  %2678 = vmatprep.subr.bf16.mxu0 %v2842_v45  ;;  %v2300_v52 = vcombine.low %v879_v43, %v883_v48  ;;  %v849_v41 = vshll.u32 %v793_v30, 16  ;;  %v826_v57 = vshrl.u32 %v788_v0, 16  ;;  %v829_v58 = vshll.u32 %v788_v0, 16  ;;  %v2869_v30 = vld [vmem:[%s3550_s3 + $0x1b0] sm:$0xff]   ;;  %v1680_v43 = vld [vmem:[#allocation2 + $0x18] sm:$0xe] }
 0x1e1   : > { %1548 = vmatprep.mubr.bf16.mxu1 %v2297_v51  ;;  %v2296_v14 = vcombine.low %v788_v0, %v789_v54  ;;  %v1640_v48 = vrot.slane %v1638_v38, 4  ;;  %v2408_v54 = vrot.slane %v1680_v43, 9 }
 0x1e2   : > { %v828_v62 = vrot.slane %v826_v57, 4  ;;  %v831_v63 = vrot.slane %v829_v58, 5  ;;  %v851_v6 = vrot.slane %v849_v41, 5  ;;  %v1622_v41 = vld [vmem:[#allocation2 + $0x2c] sm:$0x1] }
 0x1e3   : > { %2562 = vmatpush3.bf16.msra.mxu1 %v2843_v61  ;;  %2679 = vmatpush3.bf16.msra.mxu0 %v2842_v45  ;;  %v2853_v45 = vld [vmem:[%s3550_s3 + $0x188] sm:$0xff]   ;;  %v2856_v61 = vld [vmem:[%s3550_s3 + $0x210] sm:$0xff]  }
 0x1e4   : > { %2563 = vmatprep.subr.bf16.mxu1 %v2844_v3  ;;  %2680 = vmatprep.subr.bf16.mxu0 %v2845_v8  ;;  %v837_v3 = vrot.slane %v835_v40, 5  ;;  %v832_v55 = vor.u32 %v831_v63, %v828_v62  ;;  %v852_v13 = vsel %vm3289_vm8, %v847_v7, %v851_v6  ;;  %v1697_v40 = vrot.slane %v1620_v33, 5  ;;  %v1682_v58 = vld [vmem:[#allocation2 + $0x28] sm:$0xe]  ;;  %v2872_v62 = vld [vmem:[%s3550_s3 + $0x1b8] sm:$0xff]  }
 0x1e5   : > { %v2410_v2 = vrot.slane %v1682_v58, 9  ;;  %v2048_v7 = vld [vmem:[%s3552_s5] sm:$0x3] }
 0x1e6   : > { %v833_v11 = vrot.slane %v832_v55, 4  ;;  %v1698_v1 = vsel %vm3280_vm7, %v2408_v54, %v1697_v40 }
 0x1e7   : > { %2564 = vmatpush3.bf16.msra.mxu1 %v2846_v16  ;;  %2681 = vmatpush3.bf16.msra.mxu0 %v2845_v8  ;;  %v2857_v8 = vld [vmem:[%s3550_s3 + $0x190] sm:$0xff]   ;;  %v2860_v16 = vld [vmem:[%s3550_s3 + $0x198] sm:$0xff]  }
 0x1e8   : > { %2587 = vmatprep.subr.bf16.mxu1 %v2848_v34  ;;  %2686 = vmatprep.subr.bf16.mxu0 %v2849_v20  ;;  %v838_v12 = vsel %vm3289_vm8, %v833_v11, %v837_v3  ;;  %v1624_v34 = vshrl.u32 %v3473_v28, 16  ;;  %v1617_v3 = vld [vmem:[#allocation2 + $0x20] sm:$0xf] }
 0x1e9   : > { %v2298_v15 = vcombine.low %v838_v12, %v852_v13  ;;  %v1655_v12 = vshll.u32 %v1617_v3, 16 }
 0x1ea   : > { %2683 = vmatmul.mubr.bf16.vlgmr.msra.gmra.mrb[12].mxu0 %v2300_v52  ;;  %1549 = vmatmul.mubr.bf16.vlgmr.msra.gmra.mrb[8].mxu1 %v2295_v47  ;;  %v1626_v25 = vrot.slane %v1624_v34, 4  ;;  %v1635_v47 = vrot.slane %v1633_v37, 5  ;;  %v1621_v52 = vld [vmem:[#allocation2 + $0x24] sm:$0x1] }
 0x1eb   : > { %2687 = vmatpush3.bf16.msra.mxu0 %v2849_v20  ;;  %2588 = vmatpush3.bf16.msra.mxu1 %v2850_v44  ;;  %v1647_v20 = vshll.u32 %v1620_v33, 16  ;;  %v2407_v44 = vrot.slane %v1679_v22, 9  ;;  %v1701_v60 = vrot.slane %v1621_v52, 5  ;;  %v2490_v34 = vld [vmem:[%s3019_s20 + $0x160] sm:$0xff]  ;;  %v2493_v22 = vld [vmem:[%s3019_s20 + $0x190] sm:$0xff] }
 0x1ec   : > { %2688 = vmatprep.subr.bf16.mxu0 %v2852_v53  ;;  %2589 = vmatprep.subr.bf16.mxu1 %v2851_v49  ;;  %v1643_v49 = vrot.slane %v1641_v39, 5  ;;  %v2046_v39 = vpack.c.bf16 %v2491_v35, %v2490_v34  ;;  %v2496_v35 = vld [vmem:[%s3553_s6] ss:$0 sm:$0xff] }
 0x1ed   : > { %1556 = vmatprep.mubr.bf16.mxu1 %v2298_v15  ;;  %v1649_v51 = vrot.slane %v1647_v20, 5  ;;  %v1694_v0 = vsel %vm3280_vm7, %v2407_v44, %v1693_v46  ;;  %v1661_v15 = vshll.u32 %v1621_v52, 16  ;;  %v2492_v20 = vld [vmem:[%s3019_s20 + $0x180] sm:$0xff] }
 0x1ee   : > { %v1644_v57 = vor.u32 %v1643_v49, %v1640_v48  ;;  %v2415_v55 = vcombine.low %v1694_v0, %v1698_v1 }
 0x1ef   : > { %2689 = vmatpush3.bf16.msra.mxu0 %v2852_v53  ;;  %2590 = vmatpush3.bf16.msra.mxu1 %v2853_v45  ;;  %v1630_v53 = vor.u32 %v1629_v42, %v1626_v25  ;;  %v1681_v45 = vld [vmem:[#allocation2 + $0x20] sm:$0xe]  ;;  %v2047_v25 = vpack.c.bf16 %v2493_v22, %v2492_v20 }
 0x1f0   : > { %2690 = vmatprep.subr.bf16.mxu0 %v2856_v61  ;;  %2591 = vmatprep.subr.bf16.mxu1 %v2855_v4  ;;  %v2409_v59 = vrot.slane %v1681_v45, 9  ;;  %v1645_v4 = vrot.slane %v1644_v57, 4 }
 0x1f1   : > { %v1631_v63 = vrot.slane %v1630_v53, 4  ;;  %2702 = vmatprep.mubr.bf16.mxu0 %v2415_v55 }
 0x1f2   : > { %1557 = vmatmul.mubr.bf16.gmra.mrb[12].mxu1 %v2296_v14  ;;  %v1702_v6 = vsel %vm3280_vm7, %v2409_v59, %v1701_v60  ;;  %v1650_v13 = vsel %vm3289_vm8, %v1645_v4, %v1649_v51 }
 0x1f3   : > { %2691 = vmatpush3.bf16.msra.mxu0 %v2856_v61  ;;  %2592 = vmatpush3.bf16.msra.mxu1 %v2857_v8  ;;  %v1705_v61 = vrot.slane %v1622_v41, 5  ;;  %v1618_v8 = vld [vmem:[#allocation2 + $0x28] sm:$0xf] }
 0x1f4   : > { %2692 = vmatprep.subr.bf16.mxu0 %v2859_v10  ;;  %2593 = vmatprep.subr.bf16.mxu1 %v2858_v9  ;;  %v1652_v9 = vshrl.u32 %v1617_v3, 16  ;;  %v1669_v50 = vshll.u32 %v1618_v8, 16  ;;  %v2412_v37 = vcombine.low %v1617_v3, %v1618_v8 }
 0x1f5   : > { %v1706_v11 = vsel %vm3280_vm7, %v2410_v2, %v1705_v61 }
 0x1f6   : > { %v2416_v14 = vcombine.low %v1702_v6, %v1706_v11  ;;  %v1671_v28 = vrot.slane %v1669_v50, 5 }
 0x1f7   : > { %2693 = vmatpush3.bf16.msra.mxu0 %v2859_v10  ;;  %2594 = vmatpush3.bf16.msra.mxu1 %v2860_v16  ;;  %v1636_v10 = vsel %vm3289_vm8, %v1631_v63, %v1635_v47  ;;  %v1666_v16 = vshrl.u32 %v1618_v8, 16 }
 0x1f8   : > { %2694 = vmatprep.subr.bf16.mxu0 %v2862_v17  ;;  %2595 = vmatprep.subr.bf16.mxu1 %v2861_v18  ;;  %v1654_v18 = vrot.slane %v1652_v9, 4 }
 0x1fb   : > { %2695 = vmatpush3.bf16.msra.mxu0 %v2862_v17  ;;  %2596 = vmatpush3.bf16.msra.mxu1 %v2863_v19  ;;  %v2413_v17 = vcombine.low %v1636_v10, %v1650_v13  ;;  %v1657_v19 = vrot.slane %v1655_v12, 5 }
 0x1fc   : > { %2696 = vmatprep.subr.bf16.mxu0 %v2865_v21  ;;  %2597 = vmatprep.subr.bf16.mxu1 %v2864_v23  ;;  %v1668_v23 = vrot.slane %v1666_v16, 4 }
 0x1fd   : > { %1960 = vmatprep.mubr.bf16.mxu1 %v2413_v17 }
 0x1ff   : > { %2697 = vmatpush3.bf16.msra.mxu0 %v2865_v21  ;;  %2598 = vmatpush3.bf16.msra.mxu1 %v2866_v24  ;;  %v2056_v21 = vsel %vm568_vm0, %v2048_v7, 0  ;;  %v1675_v24 = vshll.u32 %v1622_v41, 16 }
 0x200   : > { %2698 = vmatprep.subr.bf16.mxu0 %v2868_v26  ;;  %2599 = vmatprep.subr.bf16.mxu1 %v2867_v27  ;;  %v1663_v27 = vrot.slane %v1661_v15, 5 }
 0x203   : > { %2699 = vmatpush3.bf16.msra.mxu0 %v2868_v26  ;;  %2600 = vmatpush3.bf16.msra.mxu1 %v2869_v30  ;;  %v1658_v26 = vor.u32 %v1657_v19, %v1654_v18  ;;  %v1672_v30 = vor.u32 %v1671_v28, %v1668_v23  ;;  %v2489_v28 = vld [vmem:[%s3551_s4] ss:$0 sm:$0xff] }
 0x204   : > { %2700 = vmatprep.subr.bf16.mxu0 %v2871_v31  ;;  %2601 = vmatprep.subr.bf16.mxu1 %v2870_v36 }
 0x205   : > { %v1659_v29 = vrot.slane %v1658_v26, 4  ;;  %v1673_v33 = vrot.slane %v1672_v30, 4 }
 0x207   : > { %2701 = vmatpush3.bf16.msra.mxu0 %v2871_v31  ;;  %2602 = vmatpush3.bf16.msra.mxu1 %v2872_v62  ;;  %v1677_v31 = vrot.slane %v1675_v24, 5  ;;  %v1664_v32 = vsel %vm3289_vm8, %v1659_v29, %v1663_v27 }
 0x208   : > { %2740 = vmatprep.subr.msk.bf16.mxu1 %vm568_vm0, %v2048_v7 }
 0x209   : > { %v1678_v36 = vsel %vm3289_vm8, %v1673_v33, %v1677_v31 }
 0x20a   : > { %2703 = vmatmul.mubr.bf16.vlgmr.msra.gmra.mrb[12].mxu0 %v2416_v14  ;;  %1961 = vmatmul.mubr.bf16.vlgmr.msra.gmra.mrb[16].mxu1 %v2411_v5  ;;  %v2414_v38 = vcombine.low %v1664_v32, %v1678_v36 }
 0x20b   : > { %2707 = vmatpush3.bf16.msra.mxu1 %v2056_v21 }
 0x20c   : > { %1968 = vmatprep.mubr.bf16.mxu1 %v2414_v38 }
 0x212   : > { %1969 = vmatmul.mubr.bf16.gmra.mrb[20].mxu1 %v2412_v37 }
 0x213   : > { %2708 = vmatprep.mubr.msk.bf16.mxu1 %vm475_vm2, %v2046_v39 }
 0x21a   : > { %2709 = vmatmul.mubr.msk.bf16.vlgmr.msra.gmra.mrb[24].mxu1 %vm475_vm2, %v2047_v25 }
 0x29d   : > { %v2527_v42 = vpop.f32.mrb[0].mxu1 }
 0x29e   : > { %v2528_v43 = vpop.f32.mrb[1].mxu1 }
 0x29f   : > { %v2529_v44 = vadd.f32 %v2528_v43, %v2527_v42  ;;  %v2530_v46 = vpop.f32.mrb[2].mxu1 }
 0x2a0   : > { %v2531_v47 = vpop.f32.mrb[3].mxu1 }
 0x2a1   : > { %v2532_v48 = vadd.f32 %v2531_v47, %v2530_v46 }
 0x2a9   : > { %v2533_v56 = vpop.f32.mrb[4].mxu1 }
 0x2aa   : > { %v2534_v49 = vpop.f32.mrb[5].mxu1 }
 0x2ab   : > { %v2535_v51 = vadd.f32 %v2534_v49, %v2533_v56  ;;  %v2536_v52 = vpop.f32.mrb[6].mxu1 }
 0x2ac   : > { %v2537_v53 = vpop.f32.mrb[7].mxu1 }
 0x2ad   : > { %v2538_v0 = vadd.f32 %v2537_v53, %v2536_v52 }
 0x2bd   : > { %v2565_v54 = vpop.f32.mrb[8].mxu1 }
 0x2be   : > { %v2566_v40 = vpop.f32.mrb[9].mxu1 }
 0x2bf   : > { %v2567_v41 = vadd.f32 %v2566_v40, %v2565_v54  ;;  %v2568_v45 = vpop.f32.mrb[10].mxu1 }
 0x2c0   : > { %v2569_v57 = vpop.f32.mrb[11].mxu1 }
 0x2c1   : > { %v2717_v58 = vadd.f32 %v2567_v41, %v2529_v44  ;;  %v2570_v59 = vadd.f32 %v2569_v57, %v2568_v45 }
 0x2c3   : > { %v2727_v60 = vadd.f32 %v2570_v59, %v2532_v48 }
 0x2c5   : > { %v2571_v61 = vpop.f32.mrb[12].mxu1 }
 0x2c6   : > { %v2572_v62 = vpop.f32.mrb[13].mxu1 }
 0x2c7   : > { %v2573_v63 = vadd.f32 %v2572_v62, %v2571_v61  ;;  %v2574_v1 = vpop.f32.mrb[14].mxu1 }
 0x2c8   : > { %v2575_v2 = vpop.f32.mrb[15].mxu1 }
 0x2c9   : > { %v2712_v3 = vadd.f32 %v2573_v63, %v2535_v51  ;;  %v2576_v4 = vadd.f32 %v2575_v2, %v2574_v1 }
 0x2cb   : > { %v2722_v55 = vadd.f32 %v2576_v4, %v2538_v0 }
 0x2dd   : > { %v2704_v5 = vpop.f32.mrb[12].mxu0  ;;  %v2603_v6 = vpop.f32.mrb[16].mxu1 }
 0x2de   : > { %v2011_v8 = vpop.f32.mrb[13].mxu0  ;;  %v2604_v10 = vpop.f32.mrb[17].mxu1 }
 0x2df   : > { %v2705_v11 = vpop.f32.mrb[14].mxu0  ;;  %v2605_v7 = vadd.f32 %v2604_v10, %v2603_v6  ;;  %v2606_v9 = vpop.f32.mrb[18].mxu1 }
 0x2e0   : > { %v2014_v12 = vpop.f32.mrb[15].mxu0  ;;  %v2607_v13 = vpop.f32.mrb[19].mxu1 }
 0x2e1   : > { %v2718_v14 = vadd.f32 %v2717_v58, %v2605_v7  ;;  %v2608_v15 = vadd.f32 %v2607_v13, %v2606_v9 }
 0x2e3   : > { %v2719_v16 = vadd.f32 %v2718_v14, %v2011_v8  ;;  %v2728_v17 = vadd.f32 %v2727_v60, %v2608_v15 }
 0x2e5   : > { %v2729_v18 = vadd.f32 %v2728_v17, %v2014_v12  ;;  %v2609_v19 = vpop.f32.mrb[20].mxu1  ;;  %v2720_v33 = vadd.f32 %v2719_v16, %v2489_v28 }
 0x2e6   : > { %v2610_v50 = vpop.f32.mrb[21].mxu1 }
 0x2e7   : > { %v2611_v21 = vadd.f32 %v2610_v50, %v2609_v19  ;;  %v2612_v23 = vpop.f32.mrb[22].mxu1  ;;  %v2730_v22 = vadd.f32 %v2729_v18, %v2489_v28 }
 0x2e8   : > { %v2613_v24 = vpop.f32.mrb[23].mxu1 }
 0x2e9   : > { %v2713_v26 = vadd.f32 %v2712_v3, %v2611_v21  ;;  %v2614_v27 = vadd.f32 %v2613_v24, %v2612_v23 }
 0x2eb   : > { %v2723_v29 = vadd.f32 %v2722_v55, %v2614_v27  ;;  %v2714_v30 = vadd.f32 %v2713_v26, %v2704_v5 }
 0x2ed   : > { %v2710_v31 = vpop.f32.mrb[24].mxu1  ;;  %v2715_v32 = vadd.f32 %v2714_v30, %v2489_v28  ;;  %v2724_v34 = vadd.f32 %v2723_v29, %v2705_v11 }
 0x2ee   : > { %v2092_v36 = vpop.f32.mrb[25].mxu1 }
 0x2ef   : > { %v2716_v37 = vadd.f32 %v2715_v32, %v2710_v31  ;;  %v2721_v38 = vadd.f32 %v2720_v33, %v2092_v36  ;;  %v2711_v39 = vpop.f32.mrb[26].mxu1  ;;  %v2725_v20 = vadd.f32 %v2724_v34, %v2489_v28 }
 0x2f0   : > { %v2095_v25 = vpop.f32.mrb[27].mxu1 }
 0x2f1   : > { %v2120_v42 = vadd.f32 %v2716_v37, %v2496_v35  ;;  %v2118_v43 = vadd.f32 %v2721_v38, %v2496_v35  ;;  %v2726_v44 = vadd.f32 %v2725_v20, %v2711_v39  ;;  %v2731_v46 = vadd.f32 %v2730_v22, %v2095_v25 }
 0x2f3   : > { %2124 = vst [vmem:[%s3047_s11 + $0x10] sm:$0xff] %v2120_v42  ;;  %2122 = vst [vmem:[%s3047_s11] sm:$0xff] %v2118_v43  ;;  %v2121_v47 = vadd.f32 %v2726_v44, %v2496_v35  ;;  %v2119_v48 = vadd.f32 %v2731_v46, %v2496_v35 }
 0x2f5   : > { %2125 = vst [vmem:[%s3047_s11 + $0x18] sm:$0xff] %v2121_v47  ;;  %2123 = vst [vmem:[%s3047_s11 + $0x8] sm:$0xff] %v2119_v48 }
 0x2f6 PF: > { %s17_s28 = sadd.s32 1, %s2913_s28   ;;  %s3563_s24 = smov %s2905_s26 }
 0x2f7   : > { %p14_p10 = scmp.ge.s32.totalorder %s17_s28, 6   ;;  %s3564_s25 = smov %s2909_s27 }
 0x2f8   : > { %s3565_s26 = smov %s3568_s29  ;;  %s3566_s27 = smov %s3572_s30 }
 0x2f9   :  { %16 = sbr.rel (!%p14_p10) target bundleno = 3 (0x3), region = 97 }

</bundles_post_ra>
